<compile_context>
chip_gen: v7x
topology: tpu7x:2x2x1
jax: 0.10.0
libtpu: 0.0.40
codegen_flags: <defaults>
</compile_context>

<pallas_src>
import functools

import jax
import jax.numpy as jnp
from jax import lax
from jax.experimental import pallas as pl
from jax.experimental.pallas import tpu as pltpu

_LANE = 128


def _round_up(x, m):
    return (x + m - 1) // m * m


def _silu(v):
    # v * sigmoid(v); sigmoid = 1 / (1 + exp(-v)).
    # exp runs on the EUP; approx reciprocal replaces the full-precision divide.
    return v * pl.reciprocal(1.0 + jnp.exp(-v), approx=True)


def _dwconv_kernel(xb_ref, dww_ref, dwb_ref, pww_ref, pwb_ref, out_ref,
                   *, ksize, stride, th, wo):
    """One (batch, row-band) tile of fused dwconv->BN->SiLU->1x1conv->BN->SiLU.

    xb_ref : ((th-1)*stride + k, Wp, Cin_p)  zero-padded input band (with halo)
    dww_ref: (k*k, Cin_p)   f32              depthwise weights * folded BN scale
    dwb_ref: (1, Cin_p)                      folded BN bias (depthwise)
    pww_ref: (Cin_p, Cout_p) bf16            pointwise weights * folded BN scale
    pwb_ref: (1, Cout_p)                     folded BN bias (pointwise)
    out_ref: (th, wo, Cout_p)
    """
    cin_p = xb_ref.shape[-1]

    # ---- depthwise conv: shift-and-accumulate over the k*k taps (VPU) ----
    acc = jnp.zeros((th, wo, cin_p), jnp.float32)
    if stride == 1:
        for i in range(ksize):
            for j in range(ksize):
                win = xb_ref[i:i + th, j:j + wo, :].astype(jnp.float32)
                acc = acc + win * dww_ref[i * ksize + j, :]
    else:
        # Value-level strided slicing: correct for any stride, modest extra XLU
        # work per tap (see TODO at top of file).
        xb = xb_ref[...].astype(jnp.float32)
        for i in range(ksize):
            for j in range(ksize):
                win = xb[i:i + (th - 1) * stride + 1:stride,
                         j:j + (wo - 1) * stride + 1:stride, :]
                acc = acc + win * dww_ref[i * ksize + j, :]

    # ---- folded-BN bias + SiLU, in (th*wo, Cin_p) 2-D layout ----
    y = acc.reshape(th * wo, cin_p) + dwb_ref[...]
    y = _silu(y)

    # ---- pointwise 1x1 conv == bf16 matmul over channels (MXU, f32 acc) ----
    z = jnp.dot(y.astype(jnp.bfloat16), pww_ref[...],
                preferred_element_type=jnp.float32)

    # ---- folded-BN bias + SiLU ----
    z = z + pwb_ref[...]
    z = _silu(z)

    out_ref[...] = z.reshape(th, wo, -1).astype(out_ref.dtype)


def _pick_band_rows(ho, stride, ksize, wp, wo, cin_p, cout_p,
                    budget_bytes=12 << 20):
    """Pick the output row-band height TH.

    Largest multiple of 8 dividing ho, keeping >=2 bands per image when possible
    (so both v7x TensorCores get work) and whose double-buffered band footprint
    stays well inside the scoped VMEM budget (v7x only has 64 MiB per TC).
    """
    cands = [t for t in range(8, ho + 1, 8) if ho % t == 0]
    if not cands:
        return ho                       # image too small / odd: single band
    if len(cands) > 1 and cands[-1] == ho:
        cands = cands[:-1]              # prefer >=2 bands per image
    for t in reversed(cands):
        band_h = (t - 1) * stride + ksize
        fp = 2 * (band_h * wp * cin_p * 4 + t * wo * cout_p * 4)
        if fp <= budget_bytes:
            return t
    return cands[0]


def dwconv_forward(x_nchw, params, *, ksize, stride):
    """Wrapper: NCHW in, NCHW out (matches PyTorch DWConv.forward)."""
    n, cin, h, w = x_nchw.shape
    pad = (ksize - 1) // 2
    ho = (h + 2 * pad - ksize) // stride + 1
    wo = (w + 2 * pad - ksize) // stride + 1
    cout = params["pw_w"].shape[1]

    cin_p = _round_up(cin, _LANE)
    cout_p = _round_up(cout, _LANE)
    wp = w + 2 * pad

    th = _pick_band_rows(ho, stride, ksize, wp, wo, cin_p, cout_p)
    nbands = ho // th
    band_h = (th - 1) * stride + ksize

    # ---- wrapper glue: NHWC layout, zero pad (spatial + channels-to-128 lanes),
    #      overlapping row bands (k-1 halo rows duplicated once per band). ----
    x_nhwc = jnp.transpose(x_nchw, (0, 2, 3, 1))
    x_pad = jnp.pad(x_nhwc, ((0, 0), (pad, pad), (pad, pad), (0, cin_p - cin)))
    rows = (jnp.arange(nbands) * th * stride)[:, None] + jnp.arange(band_h)[None, :]
    x_bands = x_pad[:, rows]            # (N, nbands, band_h, Wp, Cin_p)

    # ---- weights with BN scale folded in, zero-padded to the lane width ----
    dw_w = params["dw_w"] * params["dw_scale"].reshape(1, 1, cin)     # (k,k,Cin)
    dw_w = jnp.pad(dw_w, ((0, 0), (0, 0), (0, cin_p - cin)))
    dw_w = dw_w.reshape(ksize * ksize, cin_p).astype(jnp.float32)
    pw_w = params["pw_w"] * params["pw_scale"].reshape(1, cout)       # (Cin,Cout)
    pw_w = jnp.pad(pw_w,
                   ((0, cin_p - cin), (0, cout_p - cout))).astype(jnp.bfloat16)
    dw_bias = jnp.pad(params["dw_bias"], ((0, 0), (0, cin_p - cin)))
    pw_bias = jnp.pad(params["pw_bias"], ((0, 0), (0, cout_p - cout)))

    kernel = functools.partial(_dwconv_kernel, ksize=ksize, stride=stride,
                               th=th, wo=wo)

    flops = 2 * n * ho * wo * (ksize * ksize * cin_p + cin_p * cout_p)
    transcendentals = n * ho * wo * (cin_p + cout_p)     # one exp per SiLU element
    bytes_accessed = (x_bands.size * x_bands.dtype.itemsize
                      + n * ho * wo * cout_p * 4
                      + dw_w.size * 4 + pw_w.size * 2)

    out_nhwc = pl.pallas_call(
        kernel,
        out_shape=jax.ShapeDtypeStruct((n, ho, wo, cout_p), x_nchw.dtype),
        grid_spec=pltpu.PrefetchScalarGridSpec(
            num_scalar_prefetch=0,
            grid=(n, nbands),
            in_specs=[
                pl.BlockSpec((None, None, band_h, wp, cin_p),
                             lambda b, r: (b, r, 0, 0, 0)),
                pl.BlockSpec((ksize * ksize, cin_p), lambda b, r: (0, 0)),
                pl.BlockSpec((1, cin_p), lambda b, r: (0, 0)),
                pl.BlockSpec((cin_p, cout_p), lambda b, r: (0, 0)),
                pl.BlockSpec((1, cout_p), lambda b, r: (0, 0)),
            ],
            out_specs=pl.BlockSpec((None, th, wo, cout_p),
                                   lambda b, r: (b, r, 0, 0)),
        ),
        compiler_params=pltpu.CompilerParams(
            dimension_semantics=("parallel", "parallel"),
            # above v5e's 16 MiB scoped default, comfortably inside v7x's 64 MiB.
            vmem_limit_bytes=48 * 1024 * 1024),
        cost_estimate=pl.CostEstimate(flops=flops,
                                      transcendentals=transcendentals,
                                      bytes_accessed=bytes_accessed),
    )(x_bands, dw_w, dw_bias, pw_w, pw_bias)

    out_nhwc = out_nhwc[..., :cout]                  # drop channel padding
    return jnp.transpose(out_nhwc, (0, 3, 1, 2))     # back to NCHW


# ----------------------------- parameter setup -----------------------------

def make_params(key, cin, cout, ksize, eps=1e-5):
    """Deterministic synthetic parameters (PyTorch module shapes, folded BN)."""
    ks = jax.random.split(key, 10)
    dw_w_torch = jax.random.normal(ks[0], (cin, 1, ksize, ksize), jnp.float32) * 0.2
    pw_w_torch = jax.random.normal(ks[1], (cout, cin, 1, 1), jnp.float32) * 0.2
    dw_gamma = 1.0 + 0.1 * jax.random.normal(ks[2], (cin,), jnp.float32)
    dw_beta = 0.1 * jax.random.normal(ks[3], (cin,), jnp.float32)
    dw_mean = 0.1 * jax.random.normal(ks[4], (cin,), jnp.float32)
    dw_var = jnp.abs(jax.random.normal(ks[5], (cin,), jnp.float32)) + 0.5
    pw_gamma = 1.0 + 0.1 * jax.random.normal(ks[6], (cout,), jnp.float32)
    pw_beta = 0.1 * jax.random.normal(ks[7], (cout,), jnp.float32)
    pw_mean = 0.1 * jax.random.normal(ks[8], (cout,), jnp.float32)
    pw_var = jnp.abs(jax.random.normal(ks[9], (cout,), jnp.float32)) + 0.5

    dw_scale = dw_gamma / jnp.sqrt(dw_var + eps)
    dw_bias = dw_beta - dw_mean * dw_scale
    pw_scale = pw_gamma / jnp.sqrt(pw_var + eps)
    pw_bias = pw_beta - pw_mean * pw_scale

    return {
        # kernel-layout weights
        "dw_w": jnp.transpose(dw_w_torch[:, 0], (1, 2, 0)),      # (k, k, Cin)
        "pw_w": jnp.transpose(pw_w_torch[:, :, 0, 0], (1, 0)),   # (Cin, Cout)
        "dw_scale": dw_scale.reshape(1, cin),
        "dw_bias": dw_bias.reshape(1, cin),
        "pw_scale": pw_scale.reshape(1, cout),
        "pw_bias": pw_bias.reshape(1, cout),
        # torch-layout weights kept for the reference implementation
        "_dw_w_torch": dw_w_torch,
        "_pw_w_torch": pw_w_torch,
    }


# -------------------------- pure-JAX reference ------------------------------

def ref_forward(x_nchw, params, *, ksize, stride):
    cin = x_nchw.shape[1]
    pad = (ksize - 1) // 2
    silu = lambda t: t * jax.nn.sigmoid(t)

    dw = lax.conv_general_dilated(
        x_nchw, params["_dw_w_torch"], (stride, stride),
        [(pad, pad), (pad, pad)],
        dimension_numbers=("NCHW", "OIHW", "NCHW"),
        feature_group_count=cin)
    dw = dw * params["dw_scale"].reshape(1, -1, 1, 1) \
         + params["dw_bias"].reshape(1, -1, 1, 1)
    dw = silu(dw)

    pw = lax.conv_general_dilated(
        dw, params["_pw_w_torch"], (1, 1), [(0, 0), (0, 0)],
        dimension_numbers=("NCHW", "OIHW", "NCHW"))
    pw = pw * params["pw_scale"].reshape(1, -1, 1, 1) \
         + params["pw_bias"].reshape(1, -1, 1, 1)
    return silu(pw)


if __name__ == "__main__":
    N, CIN, COUT, H, W = 2, 4, 8, 16, 16
    KSIZE, STRIDE = 3, 1

    key = jax.random.PRNGKey(0)
    kx, kp = jax.random.split(key)
    x = jax.random.normal(kx, (N, CIN, H, W), jnp.float32)
    params = make_params(kp, CIN, COUT, KSIZE)

    out = jax.block_until_ready(
        dwconv_forward(x, params, ksize=KSIZE, stride=STRIDE))
    ref = jax.block_until_ready(
        ref_forward(x, params, ksize=KSIZE, stride=STRIDE))

    assert out.shape == ref.shape, (out.shape, ref.shape)
    err = float(jnp.max(jnp.abs(out - ref)))
    # bf16 MXU matmul + approx-reciprocal SiLU => looser tolerance than pure f32
    assert err < 3e-2, err
    print("KERNEL_OK")
</pallas_src>

<mosaic_0001>
module attributes {stable_mosaic.version = 11 : i64} {
  func.func @_dwconv_kernel(%arg0: i32, %arg1: i32, %arg2: memref<1x1x10x18x128xf32, #tpu.memory_space<vmem>>, %arg3: memref<9x128xf32, #tpu.memory_space<vmem>>, %arg4: memref<1x128xf32, #tpu.memory_space<vmem>>, %arg5: memref<128x128xbf16, #tpu.memory_space<vmem>>, %arg6: memref<1x128xf32, #tpu.memory_space<vmem>>, %arg7: memref<1x8x16x128xf32, #tpu.memory_space<vmem>>) attributes {dimension_semantics = [#tpu.dimension_semantics<parallel>, #tpu.dimension_semantics<parallel>], iteration_bounds = array<i64: 2, 2>, scalar_prefetch = 0 : i64, scratch_operands = 0 : i64, tpu.core_type = #tpu.core_type<tc>, window_params = [{transform_indices = @transform_0, window_bounds = array<i64: 1, 1, 10, 18, 128>}, {pipeline_mode = #tpu.pipeline_mode<synchronous>, transform_indices = @transform_1, window_bounds = array<i64: 9, 128>}, {pipeline_mode = #tpu.pipeline_mode<synchronous>, transform_indices = @transform_2, window_bounds = array<i64: 1, 128>}, {pipeline_mode = #tpu.pipeline_mode<synchronous>, transform_indices = @transform_3, window_bounds = array<i64: 128, 128>}, {pipeline_mode = #tpu.pipeline_mode<synchronous>, transform_indices = @transform_4, window_bounds = array<i64: 1, 128>}, {transform_indices = @transform_5, window_bounds = array<i64: 1, 8, 16, 128>}]} {
    %cst = arith.constant 0.000000e+00 : f32
    %0 = vector.broadcast %cst : f32 to vector<8x16x128xf32>
    %c0 = arith.constant 0 : index
    %c0_0 = arith.constant 0 : index
    %c0_1 = arith.constant 0 : index
    %c0_2 = arith.constant 0 : index
    %c0_3 = arith.constant 0 : index
    %1 = vector.load %arg2[%c0, %c0_0, %c0_1, %c0_2, %c0_3] : memref<1x1x10x18x128xf32, #tpu.memory_space<vmem>>, vector<1x1x8x16x128xf32>
    %2 = vector.shape_cast %1 : vector<1x1x8x16x128xf32> to vector<8x16x128xf32>
    %c0_4 = arith.constant 0 : index
    %c0_5 = arith.constant 0 : index
    %3 = vector.load %arg3[%c0_4, %c0_5] : memref<9x128xf32, #tpu.memory_space<vmem>>, vector<1x128xf32>
    %4 = vector.shape_cast %3 : vector<1x128xf32> to vector<128xf32>
    %5 = vector.shape_cast %4 : vector<128xf32> to vector<1x1x128xf32>
    %6 = vector.broadcast %5 : vector<1x1x128xf32> to vector<8x16x128xf32>
    %7 = arith.mulf %2, %6 : vector<8x16x128xf32>
    %8 = arith.addf %0, %7 : vector<8x16x128xf32>
    %c0_6 = arith.constant 0 : index
    %c0_7 = arith.constant 0 : index
    %c0_8 = arith.constant 0 : index
    %c1 = arith.constant 1 : index
    %c0_9 = arith.constant 0 : index
    %9 = vector.load %arg2[%c0_6, %c0_7, %c0_8, %c1, %c0_9] : memref<1x1x10x18x128xf32, #tpu.memory_space<vmem>>, vector<1x1x8x16x128xf32>
    %10 = vector.shape_cast %9 : vector<1x1x8x16x128xf32> to vector<8x16x128xf32>
    %c1_10 = arith.constant 1 : index
    %c0_11 = arith.constant 0 : index
    %11 = vector.load %arg3[%c1_10, %c0_11] : memref<9x128xf32, #tpu.memory_space<vmem>>, vector<1x128xf32>
    %12 = vector.shape_cast %11 : vector<1x128xf32> to vector<128xf32>
    %13 = vector.shape_cast %12 : vector<128xf32> to vector<1x1x128xf32>
    %14 = vector.broadcast %13 : vector<1x1x128xf32> to vector<8x16x128xf32>
    %15 = arith.mulf %10, %14 : vector<8x16x128xf32>
    %16 = arith.addf %8, %15 : vector<8x16x128xf32>
    %c0_12 = arith.constant 0 : index
    %c0_13 = arith.constant 0 : index
    %c0_14 = arith.constant 0 : index
    %c2 = arith.constant 2 : index
    %c0_15 = arith.constant 0 : index
    %17 = vector.load %arg2[%c0_12, %c0_13, %c0_14, %c2, %c0_15] : memref<1x1x10x18x128xf32, #tpu.memory_space<vmem>>, vector<1x1x8x16x128xf32>
    %18 = vector.shape_cast %17 : vector<1x1x8x16x128xf32> to vector<8x16x128xf32>
    %c2_16 = arith.constant 2 : index
    %c0_17 = arith.constant 0 : index
    %19 = vector.load %arg3[%c2_16, %c0_17] : memref<9x128xf32, #tpu.memory_space<vmem>>, vector<1x128xf32>
    %20 = vector.shape_cast %19 : vector<1x128xf32> to vector<128xf32>
    %21 = vector.shape_cast %20 : vector<128xf32> to vector<1x1x128xf32>
    %22 = vector.broadcast %21 : vector<1x1x128xf32> to vector<8x16x128xf32>
    %23 = arith.mulf %18, %22 : vector<8x16x128xf32>
    %24 = arith.addf %16, %23 : vector<8x16x128xf32>
    %c0_18 = arith.constant 0 : index
    %c0_19 = arith.constant 0 : index
    %c1_20 = arith.constant 1 : index
    %c0_21 = arith.constant 0 : index
    %c0_22 = arith.constant 0 : index
    %25 = vector.load %arg2[%c0_18, %c0_19, %c1_20, %c0_21, %c0_22] : memref<1x1x10x18x128xf32, #tpu.memory_space<vmem>>, vector<1x1x8x16x128xf32>
    %26 = vector.shape_cast %25 : vector<1x1x8x16x128xf32> to vector<8x16x128xf32>
    %c3 = arith.constant 3 : index
    %c0_23 = arith.constant 0 : index
    %27 = vector.load %arg3[%c3, %c0_23] : memref<9x128xf32, #tpu.memory_space<vmem>>, vector<1x128xf32>
    %28 = vector.shape_cast %27 : vector<1x128xf32> to vector<128xf32>
    %29 = vector.shape_cast %28 : vector<128xf32> to vector<1x1x128xf32>
    %30 = vector.broadcast %29 : vector<1x1x128xf32> to vector<8x16x128xf32>
    %31 = arith.mulf %26, %30 : vector<8x16x128xf32>
    %32 = arith.addf %24, %31 : vector<8x16x128xf32>
    %c0_24 = arith.constant 0 : index
    %c0_25 = arith.constant 0 : index
    %c1_26 = arith.constant 1 : index
    %c1_27 = arith.constant 1 : index
    %c0_28 = arith.constant 0 : index
    %33 = vector.load %arg2[%c0_24, %c0_25, %c1_26, %c1_27, %c0_28] : memref<1x1x10x18x128xf32, #tpu.memory_space<vmem>>, vector<1x1x8x16x128xf32>
    %34 = vector.shape_cast %33 : vector<1x1x8x16x128xf32> to vector<8x16x128xf32>
    %c4 = arith.constant 4 : index
    %c0_29 = arith.constant 0 : index
    %35 = vector.load %arg3[%c4, %c0_29] : memref<9x128xf32, #tpu.memory_space<vmem>>, vector<1x128xf32>
    %36 = vector.shape_cast %35 : vector<1x128xf32> to vector<128xf32>
    %37 = vector.shape_cast %36 : vector<128xf32> to vector<1x1x128xf32>
    %38 = vector.broadcast %37 : vector<1x1x128xf32> to vector<8x16x128xf32>
    %39 = arith.mulf %34, %38 : vector<8x16x128xf32>
    %40 = arith.addf %32, %39 : vector<8x16x128xf32>
    %c0_30 = arith.constant 0 : index
    %c0_31 = arith.constant 0 : index
    %c1_32 = arith.constant 1 : index
    %c2_33 = arith.constant 2 : index
    %c0_34 = arith.constant 0 : index
    %41 = vector.load %arg2[%c0_30, %c0_31, %c1_32, %c2_33, %c0_34] : memref<1x1x10x18x128xf32, #tpu.memory_space<vmem>>, vector<1x1x8x16x128xf32>
    %42 = vector.shape_cast %41 : vector<1x1x8x16x128xf32> to vector<8x16x128xf32>
    %c5 = arith.constant 5 : index
    %c0_35 = arith.constant 0 : index
    %43 = vector.load %arg3[%c5, %c0_35] : memref<9x128xf32, #tpu.memory_space<vmem>>, vector<1x128xf32>
    %44 = vector.shape_cast %43 : vector<1x128xf32> to vector<128xf32>
    %45 = vector.shape_cast %44 : vector<128xf32> to vector<1x1x128xf32>
    %46 = vector.broadcast %45 : vector<1x1x128xf32> to vector<8x16x128xf32>
    %47 = arith.mulf %42, %46 : vector<8x16x128xf32>
    %48 = arith.addf %40, %47 : vector<8x16x128xf32>
    %c0_36 = arith.constant 0 : index
    %c0_37 = arith.constant 0 : index
    %c2_38 = arith.constant 2 : index
    %c0_39 = arith.constant 0 : index
    %c0_40 = arith.constant 0 : index
    %49 = vector.load %arg2[%c0_36, %c0_37, %c2_38, %c0_39, %c0_40] : memref<1x1x10x18x128xf32, #tpu.memory_space<vmem>>, vector<1x1x8x16x128xf32>
    %50 = vector.shape_cast %49 : vector<1x1x8x16x128xf32> to vector<8x16x128xf32>
    %c6 = arith.constant 6 : index
    %c0_41 = arith.constant 0 : index
    %51 = vector.load %arg3[%c6, %c0_41] : memref<9x128xf32, #tpu.memory_space<vmem>>, vector<1x128xf32>
    %52 = vector.shape_cast %51 : vector<1x128xf32> to vector<128xf32>
    %53 = vector.shape_cast %52 : vector<128xf32> to vector<1x1x128xf32>
    %54 = vector.broadcast %53 : vector<1x1x128xf32> to vector<8x16x128xf32>
    %55 = arith.mulf %50, %54 : vector<8x16x128xf32>
    %56 = arith.addf %48, %55 : vector<8x16x128xf32>
    %c0_42 = arith.constant 0 : index
    %c0_43 = arith.constant 0 : index
    %c2_44 = arith.constant 2 : index
    %c1_45 = arith.constant 1 : index
    %c0_46 = arith.constant 0 : index
    %57 = vector.load %arg2[%c0_42, %c0_43, %c2_44, %c1_45, %c0_46] : memref<1x1x10x18x128xf32, #tpu.memory_space<vmem>>, vector<1x1x8x16x128xf32>
    %58 = vector.shape_cast %57 : vector<1x1x8x16x128xf32> to vector<8x16x128xf32>
    %c7 = arith.constant 7 : index
    %c0_47 = arith.constant 0 : index
    %59 = vector.load %arg3[%c7, %c0_47] : memref<9x128xf32, #tpu.memory_space<vmem>>, vector<1x128xf32>
    %60 = vector.shape_cast %59 : vector<1x128xf32> to vector<128xf32>
    %61 = vector.shape_cast %60 : vector<128xf32> to vector<1x1x128xf32>
    %62 = vector.broadcast %61 : vector<1x1x128xf32> to vector<8x16x128xf32>
    %63 = arith.mulf %58, %62 : vector<8x16x128xf32>
    %64 = arith.addf %56, %63 : vector<8x16x128xf32>
    %c0_48 = arith.constant 0 : index
    %c0_49 = arith.constant 0 : index
    %c2_50 = arith.constant 2 : index
    %c2_51 = arith.constant 2 : index
    %c0_52 = arith.constant 0 : index
    %65 = vector.load %arg2[%c0_48, %c0_49, %c2_50, %c2_51, %c0_52] : memref<1x1x10x18x128xf32, #tpu.memory_space<vmem>>, vector<1x1x8x16x128xf32>
    %66 = vector.shape_cast %65 : vector<1x1x8x16x128xf32> to vector<8x16x128xf32>
    %c8 = arith.constant 8 : index
    %c0_53 = arith.constant 0 : index
    %67 = vector.load %arg3[%c8, %c0_53] : memref<9x128xf32, #tpu.memory_space<vmem>>, vector<1x128xf32>
    %68 = vector.shape_cast %67 : vector<1x128xf32> to vector<128xf32>
    %69 = vector.shape_cast %68 : vector<128xf32> to vector<1x1x128xf32>
    %70 = vector.broadcast %69 : vector<1x1x128xf32> to vector<8x16x128xf32>
    %71 = arith.mulf %66, %70 : vector<8x16x128xf32>
    %72 = arith.addf %64, %71 : vector<8x16x128xf32>
    %73 = vector.shape_cast %72 : vector<8x16x128xf32> to vector<128x128xf32>
    %c0_54 = arith.constant 0 : index
    %c0_55 = arith.constant 0 : index
    %74 = vector.load %arg4[%c0_54, %c0_55] : memref<1x128xf32, #tpu.memory_space<vmem>>, vector<1x128xf32>
    %75 = vector.broadcast %74 : vector<1x128xf32> to vector<128x128xf32>
    %76 = arith.addf %73, %75 : vector<128x128xf32>
    %cst_56 = arith.constant 0.000000e+00 : f32
    %77 = vector.broadcast %cst_56 : f32 to vector<128x128xf32>
    %78 = arith.subf %77, %76 : vector<128x128xf32>
    %79 = math.exp %78 : vector<128x128xf32>
    %cst_57 = arith.constant 1.000000e+00 : f32
    %80 = vector.broadcast %cst_57 : f32 to vector<128x128xf32>
    %81 = arith.addf %80, %79 : vector<128x128xf32>
    %82 = tpu.reciprocal %81 {approx = true} : vector<128x128xf32> -> vector<128x128xf32>
    %83 = arith.mulf %76, %82 : vector<128x128xf32>
    %84 = arith.truncf %83 : vector<128x128xf32> to vector<128x128xbf16>
    %c0_58 = arith.constant 0 : index
    %c0_59 = arith.constant 0 : index
    %85 = vector.load %arg5[%c0_58, %c0_59] : memref<128x128xbf16, #tpu.memory_space<vmem>>, vector<128x128xbf16>
    %cst_60 = arith.constant dense<0.000000e+00> : vector<128x128xf32>
    %86 = tpu.matmul %84, %85, %cst_60 {dimension_numbers = #tpu.dot_dimension_numbers<[1], [0], [0], [1], [0, 0, 1, 1], [], []>} : vector<128x128xbf16>, vector<128x128xbf16>, vector<128x128xf32> -> vector<128x128xf32>
    %c0_61 = arith.constant 0 : index
    %c0_62 = arith.constant 0 : index
    %87 = vector.load %arg6[%c0_61, %c0_62] : memref<1x128xf32, #tpu.memory_space<vmem>>, vector<1x128xf32>
    %88 = vector.broadcast %87 : vector<1x128xf32> to vector<128x128xf32>
    %89 = arith.addf %86, %88 : vector<128x128xf32>
    %cst_63 = arith.constant 0.000000e+00 : f32
    %90 = vector.broadcast %cst_63 : f32 to vector<128x128xf32>
    %91 = arith.subf %90, %89 : vector<128x128xf32>
    %92 = math.exp %91 : vector<128x128xf32>
    %cst_64 = arith.constant 1.000000e+00 : f32
    %93 = vector.broadcast %cst_64 : f32 to vector<128x128xf32>
    %94 = arith.addf %93, %92 : vector<128x128xf32>
    %95 = tpu.reciprocal %94 {approx = true} : vector<128x128xf32> -> vector<128x128xf32>
    %96 = arith.mulf %89, %95 : vector<128x128xf32>
    %97 = vector.shape_cast %96 : vector<128x128xf32> to vector<8x16x128xf32>
    %c0_65 = arith.constant 0 : index
    %c0_66 = arith.constant 0 : index
    %c0_67 = arith.constant 0 : index
    %c0_68 = arith.constant 0 : index
    %98 = vector.load %arg7[%c0_65, %c0_66, %c0_67, %c0_68] : memref<1x8x16x128xf32, #tpu.memory_space<vmem>>, vector<1x8x16x128xf32>
    %99 = vector.shape_cast %98 : vector<1x8x16x128xf32> to vector<8x16x128xf32>
    %100 = vector.shape_cast %97 : vector<8x16x128xf32> to vector<1x8x16x128xf32>
    tpu.vector_store %arg7[%c0_65, %c0_66, %c0_67, %c0_68], %100 {strides = array<i32>} : memref<1x8x16x128xf32, #tpu.memory_space<vmem>>, vector<1x8x16x128xf32>,
    return
  }
  func.func @transform_0(%arg0: i32, %arg1: i32) -> (i32, i32, i32, i32, i32) {
    %c0_i32 = arith.constant 0 : i32
    %c0_i32_0 = arith.constant 0 : i32
    %c0_i32_1 = arith.constant 0 : i32
    %c0_i32_2 = arith.constant 0 : i32
    return %arg0, %arg1, %c0_i32, %c0_i32_0, %c0_i32_1 : i32, i32, i32, i32, i32
  }
  func.func @transform_1(%arg0: i32, %arg1: i32) -> (i32, i32) {
    %c0_i32 = arith.constant 0 : i32
    %c0_i32_0 = arith.constant 0 : i32
    %c0_i32_1 = arith.constant 0 : i32
    return %c0_i32, %c0_i32_0 : i32, i32
  }
  func.func @transform_2(%arg0: i32, %arg1: i32) -> (i32, i32) {
    %c0_i32 = arith.constant 0 : i32
    %c0_i32_0 = arith.constant 0 : i32
    %c0_i32_1 = arith.constant 0 : i32
    return %c0_i32, %c0_i32_0 : i32, i32
  }
  func.func @transform_3(%arg0: i32, %arg1: i32) -> (i32, i32) {
    %c0_i32 = arith.constant 0 : i32
    %c0_i32_0 = arith.constant 0 : i32
    %c0_i32_1 = arith.constant 0 : i32
    return %c0_i32, %c0_i32_0 : i32, i32
  }
  func.func @transform_4(%arg0: i32, %arg1: i32) -> (i32, i32) {
    %c0_i32 = arith.constant 0 : i32
    %c0_i32_0 = arith.constant 0 : i32
    %c0_i32_1 = arith.constant 0 : i32
    return %c0_i32, %c0_i32_0 : i32, i32
  }
  func.func @transform_5(%arg0: i32, %arg1: i32) -> (i32, i32, i32, i32) {
    %c0_i32 = arith.constant 0 : i32
    %c0_i32_0 = arith.constant 0 : i32
    %c0_i32_1 = arith.constant 0 : i32
    return %arg0, %arg1, %c0_i32, %c0_i32_0 : i32, i32, i32, i32
  }
}

</mosaic_0001>

<bundles_post_ra>
// kernel: tpu_custom_call.1
= control target key start
LH: loop header
LB: loop body
LE: loop exit
PB: predicated region body
PF: predicated region fallthrough
CT: control target
= control target key end

     0   :  { %10 = vsyncpa [#allocation3], 0  ;;  %s2555_s0 = inlined_call_operand.vmem [shape: f32[2,2,10,18,128], index: 0, kind: input, shape index: {}]   ;;  %s2556_s1 = inlined_call_operand.vmem [shape: f32[9,128], index: 1, kind: input, shape index: {}]   ;;  %s2557_s2 = inlined_call_operand.vmem [shape: f32[1,128], index: 2, kind: input, shape index: {}]   ;;  %s2558_s3 = inlined_call_operand.vmem [shape: bf16[128,128], index: 3, kind: input, shape index: {}]   ;;  %s2559_s4 = inlined_call_operand.vmem [shape: f32[1,128], index: 4, kind: input, shape index: {}]   ;;  %s2560_s5 = inlined_call_operand.hbm [shape: f32[2,16,16,128], index: 5, kind: output, shape index: {}]  }
   0x1   :  { %12 = vsyncpa [#allocation3 + $0x1], 0  ;;  %s1775_s18 = smov 0   ;;  %s1777_s19 = smov 0  }
   0x2   :  { %s1779_s20 = smov 0   ;;  %s1781_s21 = smov 0  }
   0x3   :  { %s1783_s22 = smov 0   ;;  %s1785_s23 = smov 0  }
   0x4   :  { %s1787_s24 = smov 0   ;;  %s1789_s25 = smov 0  }
   0x5 LB: > { %s1241_s26 = sadd.s32 4294967295, %s1740_s25   ;;  %s1242_s27 = sadd.s32 4294967294, %s1740_s25   ;;  %s1740_s25 = sphi %s1789_s25, %s18_s25   ;;  %s1736_s24 = sphi %s1787_s24, %s2606_s24   ;;  %s1732_s23 = sphi %s1785_s23, %s2605_s23   ;;  %s1728_s22 = sphi %s1783_s22, %s2604_s22   ;;  %s1724_s21 = sphi %s1781_s21, %s2603_s21   ;;  %s1720_s20 = sphi %s1779_s20, %s2602_s20   ;;  %s1716_s19 = sphi %s1777_s19, %s2601_s19   ;;  %s1712_s18 = sphi %s1775_s18, %s2600_s18  }
   0x6   : > { %s27_s28 = sadd.s32 1, %s1732_s23  ;;  %s30_s29 = sadd.s32 1, %s1736_s24 }
   0x7   : > { %p28_p0 = scmp.ge.s32.totalorder %s27_s28, 2  ;;  %p161_p1 = scmp.ne.s32.totalorder %s1720_s20, %s1716_s19 }
   0x8   : > { %p162_p2 = scmp.eq.s32.totalorder %s1241_s26, 3  ;;  %p167_p5 = scmp.ne.s32.totalorder %s1716_s19, %s1712_s18 }
   0x9   : > { %s2608_s28 = smov (%p28_p0, %s27_s28), 0  ;;  %s2610_s29 = smov (!%p28_p0, %s30_s29), %s1736_s24 }
   0xa   : > { %s147_s30 = ssub.s32 %s1732_s23, %s2608_s28  ;;  %p1826_p3 = por %p162_p2, %p161_p1 }
   0xb   : > { %p32_p4 = scmp.ge.s32.totalorder %s2610_s29, 2  ;;  %p168_p6 = scmp.eq.s32.totalorder %s1242_s27, 3 }
   0xc   : > { %p1245_p7 = scmp.ge.s32.totalorder %s1740_s25, 1  ;;  %p210_p9 = scmp.lt.s32.totalorder %s1740_s25, 5 }
   0xd   : > { %s2612_s29 = smov (%p32_p4, %s2610_s29), 0  ;;  %p1835_p8 = por %p168_p6, %p167_p5 }
   0xe   : > { %2575 = sst [smem:[#allocation5_spill]] %s2612_s29  ;;  %s146_s8 = ssub.s32 %s1736_s24, %s2612_s29 }
   0xf   : > { %s151_s9 = sadd.s32 1, %s1720_s20  ;;  %s148_s10 = sor.u32 %s147_s30, %s146_s8 }
  0x10   : > { %p211_p10 = pnand %p1245_p7, %p210_p9  ;;  %p149_p11 = scmp.eq.s32.totalorder %s148_s10, 0 }
  0x12   : > { %s1844_s11 = scalar_select %p149_p11, %s1720_s20, %s151_s9  }
  0x13   : > { %214 = sbr.rel (%p211_p10) target bundleno = 437 (0x1b5), region = 40 }
  0x1a   : > { %v1510_v0 = vld [vmem:[%s2558_s3] sm:$0xff]   ;;  %p242_p12 = scmp.lt.s32.totalorder %s1728_s22, 1  ;;  %v1511_v1 = vld [vmem:[%s2558_s3 + $0x8] sm:$0xff]   ;;  %p244_p13 = scmp.lt.s32.totalorder %s1724_s21, 1  ;;  %v1512_v2 = vld [vmem:[%s2558_s3 + $0x10] sm:$0xff]  }
  0x1b   : > { %1387 = vmatprep.subr.bf16.mxu0 %v1510_v0  ;;  %1419 = vmatprep.subr.bf16.mxu1 %v1510_v0  ;;  %v1513_v3 = vld [vmem:[%s2558_s3 + $0x18] sm:$0xff]   ;;  %v1865_v4 = vld [vmem:[%s2556_s1] ss:$0 sm:$0xff]  ;;  %v1870_v5 = vld [vmem:[%s2556_s1 + $0x1] ss:$0 sm:$0xff]  ;;  %s1370_s10 = sshll.u32 %s1724_s21, 4 }
  0x1c   : > { %s243_s16 = scalar_select %p242_p12, %s1728_s22, 1  ;;  %1388 = vmatpush3.bf16.msra.mxu0 %v1510_v0  ;;  %1427 = vmatpush3.bf16.msra.mxu1 %v1510_v0  ;;  %v1880_v6 = vld [vmem:[%s2556_s1 + $0x2] ss:$0 sm:$0xff]  ;;  %v1885_v7 = vld [vmem:[%s2556_s1 + $0x3] ss:$0 sm:$0xff]  ;;  %v1924_v31 = vld [vmem:[%s2558_s3 + $0x28] sm:$0xff]  }
  0x1d   : > { %s245_s17 = scalar_select %p244_p13, %s1724_s21, 1  ;;  %1389 = vmatprep.subr.bf16.mxu0 %v1511_v1  ;;  %1420 = vmatprep.subr.bf16.mxu1 %v1511_v1  ;;  %v1890_v8 = vld [vmem:[%s2556_s1 + $0x4] ss:$0 sm:$0xff]  ;;  %v1934_v35 = vld [vmem:[%s2556_s1 + $0x5] ss:$0 sm:$0xff] }
  0x1e   : > { %s1436_s30 = smul.u32 60, %s243_s16  ;;  %v1895_v9 = vld [vmem:[%s2558_s3 + $0x20] sm:$0xff]   ;;  %v1987_v55 = vld [vmem:[%s2556_s1 + $0x8] ss:$0 sm:$0xff]  ;;  %s1366_s12 = sshll.u32 %s1728_s22, 5 }
  0x1f   : > { %s1435_s8 = smul.u32 30, %s245_s17  ;;  %v1955_v43 = vld [vmem:[%s2556_s1 + $0x6] ss:$0 sm:$0xff]  ;;  %v1972_v49 = vld [vmem:[%s2556_s1 + $0x7] ss:$0 sm:$0xff] }
  0x20   : > { %1390 = vmatpush3.bf16.msra.mxu0 %v1511_v1  ;;  %1428 = vmatpush3.bf16.msra.mxu1 %v1511_v1 }
  0x21   : > { %s248_s9 = sadd.s32 %s1436_s30, %s1435_s8  ;;  %1391 = vmatprep.subr.bf16.mxu0 %v1512_v2  ;;  %1421 = vmatprep.subr.bf16.mxu1 %v1512_v2  ;;  %s239_s8 = sand.u32 1, %s1716_s19  }
  0x22   : > { %s1247_s13 = sshll.u32 %s248_s9, 3  ;;  %s1246_s9 = sshll.u32 %s239_s8, 7 }
  0x23   : > { %s1875_s27 = scalar_lea.vmem %s2555_s0, %s1247_s13  ;;  %s2464_s29 = scalar_lea.vmem [#allocation2], %s1246_s9 }
  0x24   : > { %v253_v10 = vld [vmem:[%s1875_s27] sm:$0xff]  ;;  %v254_v11 = vld [vmem:[%s1875_s27 + $0x8] sm:$0xff]  ;;  %1392 = vmatpush3.bf16.msra.mxu0 %v1512_v2  ;;  %1429 = vmatpush3.bf16.msra.mxu1 %v1512_v2  ;;  %v1251_v22 = vld [vmem:[%s1875_s27 + $0x18] sm:$0xff]  ;;  %s1153_s13 = sadd.s32 %s1370_s10, %s1366_s12  ;;  %s1156_s15 = sshll.u32 %s2464_s29, 4  ;;  %s2497_s15 = int_to_ptr.vmem [resolvable:$true] %s1156_s15 }
  0x25   : > { %v306_v12 = vld [vmem:[%s1875_s27 + $0x1] sm:$0xff]  ;;  %v274_v13 = vmul.f32 %v1865_v4, %v253_v10  ;;  %v275_v14 = vmul.f32 %v1865_v4, %v254_v11  ;;  %v307_v15 = vld [vmem:[%s1875_s27 + $0x9] sm:$0xff]  ;;  %1393 = vmatprep.subr.bf16.mxu0 %v1513_v3  ;;  %1422 = vmatprep.subr.bf16.mxu1 %v1513_v3  ;;  %v1268_v24 = vld [vmem:[%s1875_s27 + $0x19] sm:$0xff]  ;;  %v434_v26 = vmul.f32 %v1885_v7, %v1251_v22  ;;  %s1367_s14 = sshll.u32 %s1153_s13, 7  ;;  %s2503_s22 = scalar_lea.sflag [#allocation3], %s239_s8 }
  0x26   : > { %v327_v16 = vmul.f32 %v1870_v5, %v306_v12  ;;  %v359_v17 = vld [vmem:[%s1875_s27 + $0x2] sm:$0xff]  ;;  %v360_v18 = vld [vmem:[%s1875_s27 + $0xa] sm:$0xff]  ;;  %v328_v19 = vmul.f32 %v1870_v5, %v307_v15  ;;  %v487_v29 = vmul.f32 %v1890_v8, %v1268_v24  ;;  %v1919_v30 = vld [vmem:[%s1875_s27 + $0x1a] sm:$0xff]  ;;  %v1940_v37 = vmul.f32 %v1251_v22, %v1865_v4  ;;  %s2495_s21 = scalar_lea.hbm %s2560_s5, %s1367_s14  ;;  %s1646_s17 = scalar_lea.vmem %s2497_s15, 2048 }
  0x27   : > { %v380_v20 = vmul.f32 %v1880_v6, %v359_v17  ;;  %v381_v21 = vmul.f32 %v1880_v6, %v360_v18  ;;  %v1252_v23 = vld [vmem:[%s1875_s27 + $0x20] sm:$0xff]  ;;  %v1937_v36 = vld [vmem:[%s1875_s27 + $0x30] sm:$0xff]  ;;  %v540_v40 = vmul.f32 %v1934_v35, %v1919_v30  ;;  %v1950_v42 = vld [vmem:[%s1875_s27 + $0x38] sm:$0xff]  ;;  %v1993_v57 = vmul.f32 %v1268_v24, %v1870_v5  ;;  %p1647_p0 = scmp.ne.s32.totalorder %s2497_s15, %s1646_s17 }
  0x28   : > { %v343_v25 = vadd.f32 %v327_v16, %v274_v13  ;;  %v435_v27 = vmul.f32 %v1885_v7, %v1252_v23  ;;  %v1915_v28 = vld [vmem:[%s1875_s27 + $0x21] sm:$0xff]  ;;  %v344_v32 = vadd.f32 %v328_v19, %v275_v14  ;;  %v1943_v38 = vmul.f32 %v1252_v23, %v1865_v4  ;;  %1394 = vmatpush3.bf16.msra.mxu0 %v1513_v3  ;;  %v1958_v44 = vld [vmem:[%s1875_s27 + $0x31] sm:$0xff]  ;;  %v1967_v48 = vld [vmem:[%s1875_s27 + $0x39] sm:$0xff] }
  0x29   : > { %v488_v33 = vmul.f32 %v1890_v8, %v1915_v28  ;;  %v1929_v34 = vld [vmem:[%s1875_s27 + $0x22] sm:$0xff]  ;;  %1430 = vmatpush3.bf16.msra.mxu1 %v1513_v3  ;;  %1395 = vmatprep.subr.bf16.mxu0 %v1895_v9  ;;  %v594_v46 = vmul.f32 %v1955_v43, %v1937_v36  ;;  %v595_v47 = vmul.f32 %v1955_v43, %v1950_v42  ;;  %v1975_v50 = vld [vmem:[%s1875_s27 + $0x32] sm:$0xff]  ;;  %v1982_v54 = vld [vmem:[%s1875_s27 + $0x3a] sm:$0xff]  ;;  %p1648_p1 = pnand %p1647_p0, %p1826_p3 }
  0x2a   : > { %v396_v39 = vadd.f32 %v380_v20, %v343_v25  ;;  %v541_v41 = vmul.f32 %v1934_v35, %v1929_v34  ;;  %1423 = vmatprep.subr.bf16.mxu1 %v1895_v9  ;;  %v397_v45 = vadd.f32 %v381_v21, %v344_v32  ;;  %v647_v52 = vmul.f32 %v1972_v49, %v1958_v44  ;;  %v1990_v56 = vld [vmem:[%s1875_s27 + $0x60] sm:$0xff]  ;;  %v2002_v61 = vld [vmem:[%s1875_s27 + $0x68] sm:$0xff]  ;;  %v2034_v15 = vld [vmem:[%s1875_s27 + $0x78] sm:$0xff] }
  0x2b   : > { %v648_v53 = vmul.f32 %v1972_v49, %v1967_v48  ;;  %v700_v59 = vmul.f32 %v1987_v55, %v1975_v50  ;;  %v1999_v60 = vmul.f32 %v1987_v55, %v1982_v54  ;;  %v282_v62 = vmul.f32 %v1865_v4, %v1990_v56  ;;  %v2007_v63 = vld [vmem:[%s1875_s27 + $0x61] sm:$0xff]  ;;  %v2010_v0 = vld [vmem:[%s1875_s27 + $0x69] sm:$0xff]  ;;  %2577 = vst [vmem:[#allocation6_spill] sm:$0xff] %v2034_v15  ;;  %v2044_v21 = vld [vmem:[%s1875_s27 + $0x79] sm:$0xff]  ;;  %p1649_p2 = pneg %p1648_p1 }
  0x2c   : > { %v450_v51 = vadd.f32 %v434_v26, %v396_v39  ;;  %v451_v58 = vadd.f32 %v435_v27, %v397_v45  ;;  %1396 = vmatpush3.bf16.msra.mxu0 %v1895_v9  ;;  %v283_v2 = vmul.f32 %v1865_v4, %v2002_v61  ;;  %v335_v3 = vmul.f32 %v1870_v5, %v2007_v63  ;;  %v2019_v10 = vld [vmem:[%s1875_s27 + $0x62] sm:$0xff]  ;;  %v2022_v11 = vld [vmem:[%s1875_s27 + $0x6a] sm:$0xff]  ;;  %v1517_v39 = vld [vmem:[%s2558_s3 + $0x38] sm:$0xff]  }
  0x2d   : > { %1431 = vmatpush3.bf16.msra.mxu1 %v1895_v9  ;;  %1397 = vmatprep.subr.bf16.mxu0 %v1924_v31  ;;  %v1516_v9 = vld [vmem:[%s2558_s3 + $0x30] sm:$0xff]   ;;  %v336_v13 = vmul.f32 %v1870_v5, %v2010_v0  ;;  %v388_v14 = vmul.f32 %v1880_v6, %v2019_v10  ;;  %v389_v18 = vmul.f32 %v1880_v6, %v2022_v11  ;;  %v2039_v19 = vld [vmem:[%s1875_s27 + $0x80] sm:$0xff] }
  0x2e   : > { %v503_v1 = vadd.f32 %v487_v29, %v450_v51  ;;  %1424 = vmatprep.subr.bf16.mxu1 %v1924_v31  ;;  %v504_v12 = vadd.f32 %v488_v33, %v451_v58  ;;  %v351_v17 = vadd.f32 %v335_v3, %v282_v62  ;;  %2578 = vst [vmem:[#allocation7_spill] sm:$0xff] %v2039_v19  ;;  %2579 = vst [vmem:[#allocation8_spill] sm:$0xff] %v2044_v21  ;;  %v2049_v25 = vld [vmem:[%s1875_s27 + $0x81] sm:$0xff] }
  0x2f   : > { %v442_v20 = vmul.f32 %v1885_v7, %v2034_v15  ;;  %v352_v23 = vadd.f32 %v336_v13, %v283_v2  ;;  %v443_v24 = vmul.f32 %v1885_v7, %v2039_v19  ;;  %2580 = vst [vmem:[#allocation9_spill] sm:$0xff] %v2049_v25  ;;  %v495_v26 = vmul.f32 %v1890_v8, %v2044_v21  ;;  %v2058_v33 = vld [vmem:[%s1875_s27 + $0x7a] sm:$0xff]  ;;  %v2064_v45 = vld [vmem:[%s1875_s27 + $0x82] sm:$0xff] }
  0x30   : > { %v556_v16 = vadd.f32 %v540_v40, %v503_v1  ;;  %v557_v22 = vadd.f32 %v541_v41, %v504_v12  ;;  %1398 = vmatpush3.bf16.msra.mxu0 %v1924_v31  ;;  %v404_v29 = vadd.f32 %v388_v14, %v351_v17  ;;  %v496_v32 = vmul.f32 %v1890_v8, %v2049_v25  ;;  %v2074_v1 = vld [vmem:[%s1875_s27 + $0x98] sm:$0xff]  ;;  %v2084_v12 = vld [vmem:[%s2557_s2] ss:$0 sm:$0xff] }
  0x31   : > { %1432 = vmatpush3.bf16.msra.mxu1 %v1924_v31  ;;  %2581 = vst [vmem:[#allocation10_spill] sm:$0xff] %v2058_v33  ;;  %1399 = vmatprep.subr.bf16.mxu0 %v1516_v9  ;;  %v405_v41 = vadd.f32 %v389_v18, %v352_v23  ;;  %2582 = vst [vmem:[#allocation11_spill] sm:$0xff] %v2064_v45  ;;  %v548_v31 = vmul.f32 %v1934_v35, %v2058_v33  ;;  %v2089_v14 = vld [vmem:[%s1875_s27 + $0x99] sm:$0xff] }
  0x32   : > { %v610_v27 = vadd.f32 %v594_v46, %v556_v16  ;;  %1425 = vmatprep.subr.bf16.mxu1 %v1516_v9  ;;  %v611_v40 = vadd.f32 %v595_v47, %v557_v22  ;;  %v2069_v46 = vld [vmem:[%s1875_s27 + $0x90] sm:$0xff]  ;;  %v458_v58 = vadd.f32 %v442_v20, %v404_v29  ;;  %v549_v62 = vmul.f32 %v1934_v35, %v2064_v45 }
  0x33   : > { %v602_v2 = vmul.f32 %v1955_v43, %v2069_v46  ;;  %v2079_v47 = vld [vmem:[%s1875_s27 + $0x91] sm:$0xff]  ;;  %v603_v13 = vmul.f32 %v1955_v43, %v2074_v1 }
  0x34   : > { %v663_v51 = vadd.f32 %v647_v52, %v610_v27  ;;  %v664_v3 = vadd.f32 %v648_v53, %v611_v40  ;;  %v459_v52 = vadd.f32 %v443_v24, %v405_v41  ;;  %v655_v16 = vmul.f32 %v1972_v49, %v2079_v47  ;;  %1400 = vmatpush3.bf16.msra.mxu0 %v1516_v9  ;;  %v2096_v20 = vld [vmem:[%s1875_s27 + $0x92] sm:$0xff]  ;;  %v2100_v24 = vld [vmem:[%s1875_s27 + $0x9a] sm:$0xff] }
  0x35   : > { %1433 = vmatpush3.bf16.msra.mxu1 %v1516_v9  ;;  %v511_v18 = vadd.f32 %v495_v26, %v458_v58  ;;  %v656_v53 = vmul.f32 %v1972_v49, %v2089_v14  ;;  %1401 = vmatprep.subr.bf16.mxu0 %v1517_v39  ;;  %v708_v27 = vmul.f32 %v1987_v55, %v2096_v20 }
  0x36   : > { %v716_v17 = vadd.f32 %v700_v59, %v663_v51  ;;  %1426 = vmatprep.subr.bf16.mxu1 %v1517_v39  ;;  %v717_v22 = vadd.f32 %v1999_v60, %v664_v3  ;;  %v512_v23 = vadd.f32 %v496_v32, %v459_v52  ;;  %v709_v9 = vmul.f32 %v1987_v55, %v2100_v24 }
  0x37   : > { %v564_v59 = vadd.f32 %v548_v31, %v511_v18  ;;  %v330_v26 = vmul.f32 %v1915_v28, %v1870_v5  ;;  %v345_v32 = vadd.f32 %v1993_v57, %v1940_v37  ;;  %v382_v41 = vmul.f32 %v1919_v30, %v1880_v6 }
  0x38   : > { %v2105_v29 = vadd.f32 %v2084_v12, %v716_v17  ;;  %v2112_v40 = vadd.f32 %v2084_v12, %v717_v22  ;;  %v565_v60 = vadd.f32 %v549_v62, %v512_v23  ;;  %1402 = vmatpush3.bf16.msra.mxu0 %v1517_v39  ;;  %v383_v28 = vmul.f32 %v1929_v34, %v1880_v6 }
  0x39   : > { %1434 = vmatpush3.bf16.msra.mxu1 %v1517_v39  ;;  %v618_v51 = vadd.f32 %v602_v2, %v564_v59  ;;  %v346_v58 = vadd.f32 %v330_v26, %v1943_v38  ;;  %v398_v62 = vadd.f32 %v382_v41, %v345_v32  ;;  %v436_v37 = vmul.f32 %v1937_v36, %v1885_v7  ;;  %v2142_v41 = vld [vmem:[%s1875_s27 + $0x50] sm:$0xff] }
  0x3a   : > { %v755_v31 = vsub.f32 0.0, %v2105_v29  ;;  %v756_v3 = vsub.f32 0.0, %v2112_v40  ;;  %v619_v52 = vadd.f32 %v603_v13, %v565_v60  ;;  %v437_v39 = vmul.f32 %v1950_v42, %v1885_v7 }
  0x3b   : > { %v671_v30 = vadd.f32 %v655_v16, %v618_v51  ;;  %v399_v17 = vadd.f32 %v383_v28, %v346_v58  ;;  %v452_v18 = vadd.f32 %v436_v37, %v398_v62  ;;  %v489_v34 = vmul.f32 %v1958_v44, %v1890_v8  ;;  %v2160_v62 = vld [vmem:[%s1875_s27 + $0x4a] sm:$0xff] }
  0x3c   : > { %v771_v57 = vmul.f32 1.442695, %v755_v31  ;;  %v773_v2 = vmul.f32 1.442695, %v756_v3  ;;  %v672_v38 = vadd.f32 %v656_v53, %v619_v52  ;;  %v490_v23 = vmul.f32 %v1967_v48, %v1890_v8  ;;  %v2134_v53 = vld [vmem:[%s1875_s27 + $0x48] sm:$0xff]  ;;  %v2155_v3 = vld [vmem:[%s1875_s27 + $0x51] sm:$0xff] }
  0x3d   : > { %v724_v13 = vadd.f32 %v708_v27, %v671_v30  ;;  %v453_v22 = vadd.f32 %v437_v39, %v399_v17  ;;  %v505_v59 = vadd.f32 %v489_v34, %v452_v18  ;;  %v542_v26 = vmul.f32 %v1975_v50, %v1934_v35  ;;  %v2166_v17 = vld [vmem:[%s1875_s27 + $0x52] sm:$0xff] }
  0x3e   : > { %1518 = vpow2.f32 %v771_v57  ;;  %v725_v16 = vadd.f32 %v709_v9, %v672_v38  ;;  %v543_v27 = vmul.f32 %v1982_v54, %v1934_v35  ;;  %v596_v31 = vmul.f32 %v1955_v43, %v2134_v53  ;;  %v2147_v9 = vld [vmem:[%s1875_s27 + $0x49] sm:$0xff] }
  0x3f   : > { %1520 = vpow2.f32 %v773_v2  ;;  %v2137_v60 = vadd.f32 %v2084_v12, %v724_v13  ;;  %v506_v32 = vadd.f32 %v490_v23, %v453_v22  ;;  %v558_v58 = vadd.f32 %v542_v26, %v505_v59 }
  0x40   : > { %v2150_v51 = vadd.f32 %v2084_v12, %v725_v16  ;;  %v597_v28 = vmul.f32 %v1955_v43, %v2142_v41  ;;  %v649_v52 = vmul.f32 %v1972_v49, %v2147_v9  ;;  %v650_v30 = vmul.f32 %v1972_v49, %v2155_v3 }
  0x41   : > { %v763_v37 = vsub.f32 0.0, %v2137_v60  ;;  %v559_v57 = vadd.f32 %v543_v27, %v506_v32  ;;  %v702_v39 = vmul.f32 %v1987_v55, %v2160_v62  ;;  %v612_v38 = vadd.f32 %v596_v31, %v558_v58 }
  0x42   : > { %v764_v2 = vsub.f32 0.0, %v2150_v51  ;;  %v703_v18 = vmul.f32 %v1987_v55, %v2166_v17  ;;  %v284_v34 = vmul.f32 %v2034_v15, %v1865_v4  ;;  %v285_v23 = vmul.f32 %v2039_v19, %v1865_v4 }
  0x43   : > { %v787_v13 = vmul.f32 1.442695, %v763_v37  ;;  %v613_v22 = vadd.f32 %v597_v28, %v559_v57  ;;  %v337_v16 = vmul.f32 %v2044_v21, %v1870_v5  ;;  %v665_v26 = vadd.f32 %v649_v52, %v612_v38 }
  0x44   : > { %v789_v59 = vmul.f32 1.442695, %v764_v2  ;;  %v338_v32 = vmul.f32 %v2049_v25, %v1870_v5  ;;  %v390_v27 = vmul.f32 %v2058_v33, %v1880_v6  ;;  %v391_v28 = vmul.f32 %v2064_v45, %v1880_v6  ;;  %v2229_v45 = vld [vmem:[%s1875_s27 + $0xb2] sm:$0xff] }
  0x45   : > { %1522 = vpow2.f32 %v787_v13  ;;  %v666_v31 = vadd.f32 %v650_v30, %v613_v22  ;;  %v353_v58 = vadd.f32 %v337_v16, %v284_v34  ;;  %v718_v37 = vadd.f32 %v702_v39, %v665_v26  ;;  %2585 = vst [vmem:[#allocation14_spill] sm:$0xff] %v2229_v45 }
  0x46   : > { %1524 = vpow2.f32 %v789_v59  ;;  %v354_v57 = vadd.f32 %v338_v32, %v285_v23  ;;  %v444_v21 = vmul.f32 %v2069_v46, %v1885_v7  ;;  %v445_v25 = vmul.f32 %v2074_v1, %v1885_v7 }
  0x47   : > { %v719_v52 = vadd.f32 %v703_v18, %v666_v31  ;;  %v406_v38 = vadd.f32 %v390_v27, %v353_v58  ;;  %v497_v30 = vmul.f32 %v2079_v47, %v1890_v8  ;;  %v2192_v22 = vadd.f32 %v2084_v12, %v718_v37  ;;  %v2205_v58 = vld [vmem:[%s1875_s27 + $0xa8] sm:$0xff] }
  0x48   : > { %v1519_v2 = vpop.eup %1518  ;;  %v407_v39 = vadd.f32 %v391_v28, %v354_v57  ;;  %v498_v23 = vmul.f32 %v2089_v14, %v1890_v8  ;;  %v550_v26 = vmul.f32 %v2096_v20, %v1934_v35  ;;  %v551_v31 = vmul.f32 %v2100_v24, %v1934_v35 }
  0x49   : > { %v1521_v34 = vpop.eup %1520  ;;  %v803_v13 = vadd.f32 1.0, %v1519_v2  ;;  %2583 = vst [vmem:[#allocation12_spill] sm:$0xff] %v2192_v22  ;;  %v2197_v16 = vadd.f32 %v2084_v12, %v719_v52  ;;  %v460_v59 = vadd.f32 %v444_v21, %v406_v38  ;;  %v757_v32 = vsub.f32 0.0, %v2192_v22  ;;  %v2209_v21 = vld [vmem:[%s1875_s27 + $0xb0] sm:$0xff] }
  0x4a   : > { %v804_v18 = vadd.f32 1.0, %v1521_v34  ;;  %v461_v27 = vadd.f32 %v445_v25, %v407_v39  ;;  %v604_v57 = vmul.f32 %v1955_v43, %v2205_v58  ;;  %v2214_v2 = vld [vmem:[%s1875_s27 + $0xa9] sm:$0xff]  ;;  %v605_v25 = vmul.f32 %v1955_v43, %v2209_v21  ;;  %v2219_v34 = vld [vmem:[%s1875_s27 + $0xb1] sm:$0xff] }
  0x4b   : > { %2584 = vst [vmem:[#allocation13_spill] sm:$0xff] %v2197_v16  ;;  %1526 = vrcp.f32 %v803_v13  ;;  %v758_v28 = vsub.f32 0.0, %v2197_v16  ;;  %v513_v37 = vadd.f32 %v497_v30, %v460_v59  ;;  %v775_v52 = vmul.f32 1.442695, %v757_v32  ;;  %v2224_v39 = vld [vmem:[%s1875_s27 + $0xaa] sm:$0xff] }
  0x4c   : > { %1528 = vrcp.f32 %v804_v18  ;;  %v514_v38 = vadd.f32 %v498_v23, %v461_v27  ;;  %v657_v13 = vmul.f32 %v1972_v49, %v2214_v2  ;;  %v658_v59 = vmul.f32 %v1972_v49, %v2219_v34 }
  0x4d   : > { %v777_v30 = vmul.f32 1.442695, %v758_v28  ;;  %v566_v18 = vadd.f32 %v550_v26, %v513_v37  ;;  %v710_v23 = vmul.f32 %v1987_v55, %v2224_v39  ;;  %1530 = vpow2.f32 %v775_v52 }
  0x4e   : > { %v567_v32 = vadd.f32 %v551_v31, %v514_v38  ;;  %v711_v27 = vmul.f32 %v1987_v55, %v2229_v45  ;;  %v278_v33 = vmul.f32 %v1937_v36, %v1865_v4  ;;  %v279_v26 = vmul.f32 %v1950_v42, %v1865_v4 }
  0x4f   : > { %v1523_v19 = vpop.eup %1522  ;;  %1532 = vpow2.f32 %v777_v30  ;;  %v620_v28 = vadd.f32 %v604_v57, %v566_v18  ;;  %v331_v37 = vmul.f32 %v1958_v44, %v1870_v5  ;;  %v332_v31 = vmul.f32 %v1967_v48, %v1870_v5 }
  0x50   : > { %v1525_v15 = vpop.eup %1524  ;;  %v811_v16 = vadd.f32 1.0, %v1523_v19  ;;  %v621_v22 = vadd.f32 %v605_v25, %v567_v32  ;;  %v384_v52 = vmul.f32 %v1975_v50, %v1880_v6  ;;  %v385_v57 = vmul.f32 %v1982_v54, %v1880_v6 }
  0x51   : > { %v812_v38 = vadd.f32 1.0, %v1525_v15  ;;  %v673_v36 = vadd.f32 %v657_v13, %v620_v28  ;;  %v347_v45 = vadd.f32 %v331_v37, %v278_v33  ;;  %v348_v30 = vadd.f32 %v332_v31, %v279_v26 }
  0x52   : > { %1534 = vrcp.f32 %v811_v16  ;;  %v674_v42 = vadd.f32 %v658_v59, %v621_v22  ;;  %v438_v44 = vmul.f32 %v2134_v53, %v1885_v7  ;;  %v439_v48 = vmul.f32 %v2142_v41, %v1885_v7 }
  0x53   : > { %1536 = vrcp.f32 %v812_v38  ;;  %v726_v19 = vadd.f32 %v710_v23, %v673_v36  ;;  %v400_v25 = vadd.f32 %v384_v52, %v347_v45  ;;  %v401_v15 = vadd.f32 %v385_v57, %v348_v30 }
  0x54   : > { %v727_v50 = vadd.f32 %v711_v27, %v674_v42  ;;  %v491_v33 = vmul.f32 %v2147_v9, %v1890_v8  ;;  %v492_v54 = vmul.f32 %v2155_v3, %v1890_v8  ;;  %v544_v45 = vmul.f32 %v2160_v62, %v1934_v35 }
  0x55   : > { %v1527_v18 = vpop.eup %1526  ;;  %v2257_v13 = vadd.f32 %v2084_v12, %v726_v19  ;;  %v454_v59 = vadd.f32 %v438_v44, %v400_v25  ;;  %v455_v27 = vadd.f32 %v439_v48, %v401_v15  ;;  %v545_v28 = vmul.f32 %v2166_v17, %v1934_v35 }
  0x56   : > { %v1529_v22 = vpop.eup %1528  ;;  %v835_v16 = vmul.f32 %v1527_v18, %v2105_v29  ;;  %v2263_v32 = vadd.f32 %v2084_v12, %v727_v50  ;;  %v598_v29 = vmul.f32 %v1955_v43, %v1990_v56  ;;  %v599_v31 = vmul.f32 %v1955_v43, %v2002_v61 }
  0x57   : > { %v836_v23 = vmul.f32 %v1529_v22, %v2112_v40  ;;  %v765_v26 = vsub.f32 0.0, %v2257_v13  ;;  %v507_v37 = vadd.f32 %v491_v33, %v454_v59  ;;  %v1531_v52 = vpop.eup %1530  ;;  %v508_v36 = vadd.f32 %v492_v54, %v455_v27 }
  0x58   : > { %v766_v40 = vsub.f32 0.0, %v2263_v32  ;;  %v651_v57 = vmul.f32 %v1972_v49, %v2007_v63  ;;  %v805_v30 = vadd.f32 1.0, %v1531_v52  ;;  %v652_v25 = vmul.f32 %v1972_v49, %v2010_v0 }
  0x59   : > { %v851_v38 = vpack.c.bf16 %v836_v23, %v835_v16  ;;  %v1533_v42 = vpop.eup %1532  ;;  %v791_v44 = vmul.f32 1.442695, %v765_v26  ;;  %v560_v19 = vadd.f32 %v544_v45, %v507_v37  ;;  %v561_v50 = vadd.f32 %v545_v28, %v508_v36 }
  0x5a   : > { %v806_v48 = vadd.f32 1.0, %v1533_v42  ;;  %v793_v18 = vmul.f32 1.442695, %v766_v40  ;;  %v704_v15 = vmul.f32 %v1987_v55, %v2019_v10  ;;  %1538 = vrcp.f32 %v805_v30 }
  0x5b   : > { %1403 = vmatprep.mubr.bf16.mxu0 %v851_v38  ;;  %v614_v33 = vadd.f32 %v598_v29, %v560_v19  ;;  %v705_v54 = vmul.f32 %v1987_v55, %v2022_v11  ;;  %v286_v22 = vmul.f32 %v2069_v46, %v1865_v4  ;;  %v615_v59 = vadd.f32 %v599_v31, %v561_v50  ;;  %v2588_v19 = vld [vmem:[#allocation14_spill] sm:$0xff] }
  0x5c   : > { %v1535_v16 = vpop.eup %1534  ;;  %1540 = vrcp.f32 %v806_v48  ;;  %v287_v45 = vmul.f32 %v2074_v1, %v1865_v4  ;;  %v339_v23 = vmul.f32 %v2079_v47, %v1870_v5  ;;  %v340_v37 = vmul.f32 %v2089_v14, %v1870_v5  ;;  %v2314_v48 = vld [vmem:[%s1875_s27 + $0xc0] sm:$0xff] }
  0x5d   : > { %v1537_v27 = vpop.eup %1536  ;;  %v843_v28 = vmul.f32 %v1535_v16, %v2137_v60  ;;  %1542 = vpow2.f32 %v791_v44  ;;  %v667_v26 = vadd.f32 %v651_v57, %v614_v33  ;;  %v668_v46 = vadd.f32 %v652_v25, %v615_v59  ;;  %v2318_v33 = vld [vmem:[%s1875_s27 + $0xc8] sm:$0xff] }
  0x5e   : > { %v844_v29 = vmul.f32 %v1537_v27, %v2150_v51  ;;  %1544 = vpow2.f32 %v793_v18  ;;  %v355_v52 = vadd.f32 %v339_v23, %v286_v22  ;;  %v356_v38 = vadd.f32 %v340_v37, %v287_v45  ;;  %v2323_v22 = vld [vmem:[%s1875_s27 + $0xc1] sm:$0xff]  ;;  %v2326_v16 = vld [vmem:[%s1875_s27 + $0xc9] sm:$0xff] }
  0x5f   : > { %v720_v31 = vadd.f32 %v704_v15, %v667_v26  ;;  %v392_v1 = vmul.f32 %v2096_v20, %v1880_v6  ;;  %v393_v47 = vmul.f32 %v2100_v24, %v1880_v6  ;;  %v721_v40 = vadd.f32 %v705_v54, %v668_v46 }
  0x60   : > { %v855_v60 = vpack.c.bf16 %v844_v29, %v843_v28  ;;  %v446_v14 = vmul.f32 %v2205_v58, %v1885_v7  ;;  %v447_v51 = vmul.f32 %v2209_v21, %v1885_v7  ;;  %v499_v20 = vmul.f32 %v2214_v2, %v1890_v8  ;;  %v2336_v28 = vld [vmem:[%s1875_s27 + $0xc2] sm:$0xff] }
  0x61   : > { %v2300_v36 = vadd.f32 %v2084_v12, %v720_v31  ;;  %v408_v57 = vadd.f32 %v392_v1, %v355_v52  ;;  %v409_v42 = vadd.f32 %v393_v47, %v356_v38  ;;  %v2305_v24 = vadd.f32 %v2084_v12, %v721_v40  ;;  %v2339_v52 = vld [vmem:[%s1875_s27 + $0xca] sm:$0xff] }
  0x62   : > { %1411 = vmatprep.mubr.bf16.mxu1 %v855_v60  ;;  %v500_v30 = vmul.f32 %v2219_v34, %v1890_v8  ;;  %v552_v44 = vmul.f32 %v2224_v39, %v1934_v35  ;;  %v553_v25 = vmul.f32 %v2588_v19, %v1934_v35  ;;  %v606_v54 = vmul.f32 %v1955_v43, %v2314_v48  ;;  %v2589_v1 = vld [vmem:[#allocation12_spill] sm:$0xff] }
  0x63   : > { %2586 = vst [vmem:[#allocation15_spill] sm:$0xff] %v2300_v36  ;;  %2587 = vst [vmem:[#allocation16_spill] sm:$0xff] %v2305_v24  ;;  %v759_v18 = vsub.f32 0.0, %v2300_v36  ;;  %v462_v50 = vadd.f32 %v446_v14, %v408_v57  ;;  %v463_v15 = vadd.f32 %v447_v51, %v409_v42  ;;  %v760_v59 = vsub.f32 0.0, %v2305_v24  ;;  %v2590_v57 = vld [vmem:[#allocation13_spill] sm:$0xff] }
  0x64   : > { %v607_v45 = vmul.f32 %v1955_v43, %v2318_v33  ;;  %v659_v23 = vmul.f32 %v1972_v49, %v2323_v22  ;;  %v660_v27 = vmul.f32 %v1972_v49, %v2326_v16  ;;  %v1539_v26 = vpop.eup %1538  ;;  %v712_v31 = vmul.f32 %v1987_v55, %v2336_v28 }
  0x65   : > { %v779_v37 = vmul.f32 1.442695, %v759_v18  ;;  %v515_v29 = vadd.f32 %v499_v20, %v462_v50  ;;  %v516_v46 = vadd.f32 %v500_v30, %v463_v15  ;;  %v837_v47 = vmul.f32 %v1539_v26, %v2589_v1 }
  0x66   : > { %v1541_v38 = vpop.eup %1540  ;;  %v781_v60 = vmul.f32 1.442695, %v760_v59  ;;  %v713_v40 = vmul.f32 %v1987_v55, %v2339_v52  ;;  %v280_v14 = vmul.f32 %v2134_v53, %v1865_v4  ;;  %v281_v15 = vmul.f32 %v2142_v41, %v1865_v4 }
  0x67   : > { %v1543_v51 = vpop.eup %1542  ;;  %v838_v42 = vmul.f32 %v1541_v38, %v2590_v57  ;;  %1546 = vpow2.f32 %v779_v37  ;;  %v568_v20 = vadd.f32 %v552_v44, %v515_v29  ;;  %v569_v30 = vadd.f32 %v553_v25, %v516_v46 }
  0x68   : > { %v1545_v18 = vpop.eup %1544  ;;  %v813_v50 = vadd.f32 1.0, %v1543_v51  ;;  %1548 = vpow2.f32 %v781_v60  ;;  %v333_v59 = vmul.f32 %v2147_v9, %v1870_v5  ;;  %v334_v53 = vmul.f32 %v2155_v3, %v1870_v5  ;;  %v2594_v51 = vld [vmem:[#allocation9_spill] sm:$0xff] }
  0x69   : > { %v852_v26 = vpack.c.bf16 %v838_v42, %v837_v47  ;;  %v814_v1 = vadd.f32 1.0, %v1545_v18  ;;  %v622_v24 = vadd.f32 %v606_v54, %v568_v20  ;;  %v623_v36 = vadd.f32 %v607_v45, %v569_v30  ;;  %v2592_v47 = vld [vmem:[#allocation7_spill] sm:$0xff]  ;;  %v2595_v30 = vld [vmem:[#allocation10_spill] sm:$0xff] }
  0x6a   : > { %1550 = vrcp.f32 %v813_v50  ;;  %v349_v37 = vadd.f32 %v333_v59, %v280_v14  ;;  %v386_v44 = vmul.f32 %v2160_v62, %v1880_v6  ;;  %v387_v41 = vmul.f32 %v2166_v17, %v1880_v6  ;;  %v2593_v14 = vld [vmem:[#allocation8_spill] sm:$0xff]  ;;  %v2596_v50 = vld [vmem:[#allocation11_spill] sm:$0xff] }
  0x6b   : > { %1404 = vmatmul.mubr.bf16.vlgmr.msra.gmra.mrb[0].mxu0 %v852_v26  ;;  %1552 = vrcp.f32 %v814_v1  ;;  %v675_v25 = vadd.f32 %v659_v23, %v622_v24  ;;  %v676_v29 = vadd.f32 %v660_v27, %v623_v36  ;;  %v350_v9 = vadd.f32 %v334_v53, %v281_v15 }
  0x6c   : > { %v402_v46 = vadd.f32 %v386_v44, %v349_v37  ;;  %v440_v54 = vmul.f32 %v1885_v7, %v1990_v56  ;;  %v441_v45 = vmul.f32 %v1885_v7, %v2002_v61  ;;  %v493_v62 = vmul.f32 %v1890_v8, %v2007_v63 }
  0x6d   : > { %v728_v3 = vadd.f32 %v712_v31, %v675_v25  ;;  %v729_v38 = vadd.f32 %v713_v40, %v676_v29  ;;  %v494_v24 = vmul.f32 %v1890_v8, %v2010_v0  ;;  %v403_v36 = vadd.f32 %v387_v41, %v350_v9  ;;  %v2591_v31 = vld [vmem:[#allocation6_spill] sm:$0xff] }
  0x6e   : > { %v456_v23 = vadd.f32 %v440_v54, %v402_v46  ;;  %v546_v17 = vmul.f32 %v1934_v35, %v2019_v10  ;;  %v547_v27 = vmul.f32 %v1934_v35, %v2022_v11  ;;  %v600_v63 = vmul.f32 %v1955_v43, %v2591_v31 }
  0x6f   : > { %v2372_v56 = vadd.f32 %v2084_v12, %v728_v3  ;;  %v2375_v61 = vadd.f32 %v2084_v12, %v729_v38  ;;  %v601_v0 = vmul.f32 %v1955_v43, %v2592_v47  ;;  %v457_v60 = vadd.f32 %v441_v45, %v403_v36  ;;  %v1316_v47 = vld [vmem:[%s1875_s27 + $0xd8] sm:$0xff] }
  0x70   : > { %v509_v40 = vadd.f32 %v493_v62, %v456_v23  ;;  %v653_v10 = vmul.f32 %v1972_v49, %v2593_v14  ;;  %v654_v11 = vmul.f32 %v1972_v49, %v2594_v51  ;;  %v706_v18 = vmul.f32 %v1987_v55, %v2595_v30 }
  0x71   : > { %v1547_v57 = vpop.eup %1546  ;;  %v767_v42 = vsub.f32 0.0, %v2372_v56  ;;  %v768_v20 = vsub.f32 0.0, %v2375_v61  ;;  %v707_v15 = vmul.f32 %v1987_v55, %v2596_v50  ;;  %v510_v1 = vadd.f32 %v494_v24, %v457_v60 }
  0x72   : > { %v1549_v59 = vpop.eup %1548  ;;  %v807_v26 = vadd.f32 1.0, %v1547_v57  ;;  %v562_v53 = vadd.f32 %v546_v17, %v509_v40  ;;  %v288_v37 = vmul.f32 %v2205_v58, %v1865_v4  ;;  %v289_v41 = vmul.f32 %v2209_v21, %v1865_v4  ;;  %v1350_v57 = vld [vmem:[%s1875_s27 + $0xda] sm:$0xff] }
  0x73   : > { %v808_v44 = vadd.f32 1.0, %v1549_v59  ;;  %v795_v25 = vmul.f32 1.442695, %v767_v42  ;;  %v797_v29 = vmul.f32 1.442695, %v768_v20  ;;  %v563_v46 = vadd.f32 %v547_v27, %v510_v1 }
  0x74   : > { %v1551_v9 = vpop.eup %1550  ;;  %1554 = vrcp.f32 %v807_v26  ;;  %v616_v54 = vadd.f32 %v600_v63, %v562_v53  ;;  %v341_v45 = vmul.f32 %v2214_v2, %v1870_v5  ;;  %v342_v58 = vmul.f32 %v2219_v34, %v1870_v5  ;;  %v2598_v53 = vld [vmem:[#allocation16_spill] sm:$0xff] }
  0x75   : > { %v1553_v3 = vpop.eup %1552  ;;  %v845_v38 = vmul.f32 %v1551_v9, %v2257_v13  ;;  %1556 = vrcp.f32 %v808_v44  ;;  %v394_v62 = vmul.f32 %v2224_v39, %v1880_v6  ;;  %v617_v4 = vadd.f32 %v601_v0, %v563_v46 }
  0x76   : > { %v846_v24 = vmul.f32 %v1553_v3, %v2263_v32  ;;  %1558 = vpow2.f32 %v795_v25  ;;  %v669_v21 = vadd.f32 %v653_v10, %v616_v54  ;;  %v357_v36 = vadd.f32 %v341_v45, %v288_v37  ;;  %v1334_v10 = vld [vmem:[%s1875_s27 + $0xe1] sm:$0xff] }
  0x77   : > { %1560 = vpow2.f32 %v797_v29  ;;  %v358_v2 = vadd.f32 %v342_v58, %v289_v41  ;;  %v395_v13 = vmul.f32 %v2588_v19, %v1880_v6  ;;  %v670_v17 = vadd.f32 %v654_v11, %v617_v4 }
  0x78   : > { %v856_v23 = vpack.c.bf16 %v846_v24, %v845_v38  ;;  %v722_v27 = vadd.f32 %v706_v18, %v669_v21  ;;  %v448_v5 = vmul.f32 %v2314_v48, %v1885_v7  ;;  %v410_v34 = vadd.f32 %v394_v62, %v357_v36  ;;  %v1317_v48 = vld [vmem:[%s1875_s27 + $0xe0] sm:$0xff]  ;;  %v2597_v18 = vld [vmem:[#allocation15_spill] sm:$0xff] }
  0x79   : > { %v411_v39 = vadd.f32 %v395_v13, %v358_v2  ;;  %v449_v32 = vmul.f32 %v2318_v33, %v1885_v7  ;;  %v501_v31 = vmul.f32 %v2323_v22, %v1890_v8  ;;  %v723_v63 = vadd.f32 %v707_v15, %v670_v17  ;;  %v1333_v22 = vld [vmem:[%s1875_s27 + $0xd9] sm:$0xff] }
  0x7a   : > { %1412 = vmatmul.mubr.bf16.vlgmr.msra.gmra.mrb[0].mxu1 %v856_v23  ;;  %v2412_v6 = vadd.f32 %v2084_v12, %v722_v27  ;;  %v502_v19 = vmul.f32 %v2326_v16, %v1890_v8  ;;  %v464_v0 = vadd.f32 %v448_v5, %v410_v34  ;;  %v554_v7 = vmul.f32 %v2336_v28, %v1934_v35 }
  0x7b   : > { %v465_v60 = vadd.f32 %v449_v32, %v411_v39  ;;  %v555_v33 = vmul.f32 %v2339_v52, %v1934_v35  ;;  %v2424_v40 = vadd.f32 %v2084_v12, %v723_v63  ;;  %v608_v16 = vmul.f32 %v1955_v43, %v1316_v47  ;;  %v1351_v52 = vld [vmem:[%s1875_s27 + $0xe2] sm:$0xff]  ;;  %s1742_s27 = smov [#allocation2]  }
  0x7c   : > { %v761_v14 = vsub.f32 0.0, %v2412_v6  ;;  %v517_v51 = vadd.f32 %v501_v31, %v464_v0  ;;  %v609_v11 = vmul.f32 %v1955_v43, %v1317_v48  ;;  %v661_v35 = vmul.f32 %v1972_v49, %v1333_v22  ;;  %s1650_s30 = sshll.u32 %s1742_s27, 4  ;;  %s1651_s30 = int_to_ptr.vmem [resolvable:$false] %s1650_s30 }
  0x7d   : > { %v518_v8 = vadd.f32 %v502_v19, %v465_v60  ;;  %v762_v28 = vsub.f32 0.0, %v2424_v40  ;;  %v662_v26 = vmul.f32 %v1972_v49, %v1334_v10  ;;  %v714_v44 = vmul.f32 %v1987_v55, %v1350_v57  ;;  %s1652_s9 = scalar_lea.vmem %s1651_s30, 4096  ;;  %p1653_p4 = scmp.lt.s32.totalorder %s2497_s15, %s1651_s30 }
  0x7e   : > { %v1555_v42 = vpop.eup %1554  ;;  %v783_v20 = vmul.f32 1.442695, %v761_v14  ;;  %v570_v15 = vadd.f32 %v554_v7, %v517_v51  ;;  %v715_v46 = vmul.f32 %v1987_v55, %v1351_v52  ;;  %p1654_p5 = scmp.lt.s32.totalorder %s1652_s9, %s1646_s17 }
  0x7f   : > { %v1557_v30 = vpop.eup %1556  ;;  %v839_v50 = vmul.f32 %v1555_v42, %v2597_v18  ;;  %v571_v59 = vadd.f32 %v555_v33, %v518_v8  ;;  %v785_v43 = vmul.f32 1.442695, %v762_v28 }
  0x80   : > { %v1559_v1 = vpop.eup %1558  ;;  %v840_v37 = vmul.f32 %v1557_v30, %v2598_v53  ;;  %1562 = vpow2.f32 %v783_v20  ;;  %v624_v41 = vadd.f32 %v608_v16, %v570_v15  ;;  %p1655_p6 = por %p1654_p5, %p1653_p4 }
  0x81   : > { %v1561_v25 = vpop.eup %1560  ;;  %v815_v29 = vadd.f32 1.0, %v1559_v1  ;;  %v625_v9 = vadd.f32 %v609_v11, %v571_v59  ;;  %1564 = vpow2.f32 %v785_v43 }
  0x82   : > { %v853_v54 = vpack.c.bf16 %v840_v37, %v839_v50  ;;  %v816_v45 = vadd.f32 1.0, %v1561_v25  ;;  %v677_v3 = vadd.f32 %v661_v35, %v624_v41  ;;  %p1656_p7 = pnand %p1655_p6, %p1649_p2 }
  0x83   : > { %1566 = vrcp.f32 %v815_v29  ;;  %v678_v38 = vadd.f32 %v662_v26, %v625_v9 }
  0x84   : > { %1407 = vmatprep.mubr.bf16.mxu0 %v853_v54  ;;  %1568 = vrcp.f32 %v816_v45  ;;  %v730_v49 = vadd.f32 %v714_v44, %v677_v3 }
  0x85   : > { %v731_v58 = vadd.f32 %v715_v46, %v678_v38 }
  0x86   : > { %v753_v62 = vadd.f32 %v2084_v12, %v730_v49 }
  0x87   : > { %v754_v24 = vadd.f32 %v2084_v12, %v731_v58 }
  0x88   : > { %v769_v4 = vsub.f32 0.0, %v753_v62 }
  0x89   : > { %v770_v21 = vsub.f32 0.0, %v754_v24 }
  0x8a   : > { %v1563_v36 = vpop.eup %1562  ;;  %v799_v13 = vmul.f32 1.442695, %v769_v4 }
  0x8b   : > { %v809_v2 = vadd.f32 1.0, %v1563_v36  ;;  %v1565_v55 = vpop.eup %1564  ;;  %v801_v23 = vmul.f32 1.442695, %v770_v21 }
  0x8c   : > { %v810_v27 = vadd.f32 1.0, %v1565_v55 }
  0x8d   : > { %v1567_v17 = vpop.eup %1566  ;;  %1570 = vrcp.f32 %v809_v2 }
  0x8e   : > { %v1569_v5 = vpop.eup %1568  ;;  %v847_v34 = vmul.f32 %v1567_v17, %v2372_v56  ;;  %1572 = vpow2.f32 %v799_v13 }
  0x8f   : > { %v848_v39 = vmul.f32 %v1569_v5, %v2375_v61  ;;  %1574 = vrcp.f32 %v810_v27 }
  0x90   : > { %1576 = vpow2.f32 %v801_v23 }
  0x91   : > { %v857_v32 = vpack.c.bf16 %v848_v39, %v847_v34 }
  0x93   : > { %1415 = vmatprep.mubr.bf16.mxu1 %v857_v32 }
  0x97   : > { %v1571_v12 = vpop.eup %1570 }
  0x98   : > { %v1573_v31 = vpop.eup %1572  ;;  %v841_v63 = vmul.f32 %v1571_v12, %v2412_v6  ;;  %v2448_v6 = vld [vmem:[%s2559_s4] ss:$0 sm:$0xff] }
  0x99   : > { %v1575_v19 = vpop.eup %1574  ;;  %v817_v47 = vadd.f32 1.0, %v1573_v31 }
  0x9a   : > { %v1577_v48 = vpop.eup %1576  ;;  %v842_v0 = vmul.f32 %v1575_v19, %v2424_v40 }
  0x9b   : > { %v818_v60 = vadd.f32 1.0, %v1577_v48  ;;  %1578 = vrcp.f32 %v817_v47 }
  0x9c   : > { %v854_v7 = vpack.c.bf16 %v842_v0, %v841_v63 }
  0x9d   : > { %1580 = vrcp.f32 %v818_v60 }
  0x9e   : > { %1408 = vmatmul.mubr.bf16.gmra.mrb[4].mxu0 %v854_v7 }
  0xa5   : > { %v1579_v56 = vpop.eup %1578 }
  0xa6   : > { %v849_v61 = vmul.f32 %v1579_v56, %v753_v62 }
  0xa7   : > { %v1581_v33 = vpop.eup %1580 }
  0xa8   : > { %v850_v22 = vmul.f32 %v1581_v33, %v754_v24 }
  0xaa   : > { %v858_v14 = vpack.c.bf16 %v850_v22, %v849_v61 }
  0xac   : > { %1416 = vmatmul.mubr.bf16.gmra.mrb[4].mxu1 %v858_v14 }
 0x13e   : > { %v1405_v10 = vpop.f32.mrb[0].mxu0 }
 0x13f   : > { %v973_v51 = vadd.f32 %v1405_v10, %v2448_v6  ;;  %v964_v40 = vpop.f32.mrb[1].mxu0 }
 0x140   : > { %v965_v8 = vadd.f32 %v2448_v6, %v964_v40  ;;  %v1406_v16 = vpop.f32.mrb[2].mxu0 }
 0x141   : > { %v1029_v11 = vsub.f32 0.0, %v973_v51  ;;  %v976_v57 = vadd.f32 %v1406_v16, %v2448_v6  ;;  %v967_v42 = vpop.f32.mrb[3].mxu0 }
 0x142   : > { %v1027_v28 = vsub.f32 0.0, %v965_v8  ;;  %v2454_v20 = vadd.f32 %v2448_v6, %v967_v42 }
 0x143   : > { %v1047_v35 = vmul.f32 1.442695, %v1029_v11  ;;  %v1030_v52 = vsub.f32 0.0, %v976_v57 }
 0x144   : > { %v1043_v30 = vmul.f32 1.442695, %v1027_v28  ;;  %v1028_v18 = vsub.f32 0.0, %v2454_v20 }
 0x145   : > { %1582 = vpow2.f32 %v1047_v35  ;;  %v1049_v50 = vmul.f32 1.442695, %v1030_v52 }
 0x146   : > { %1584 = vpow2.f32 %v1043_v30  ;;  %v1045_v15 = vmul.f32 1.442695, %v1028_v18 }
 0x147   : > { %1586 = vpow2.f32 %v1049_v50 }
 0x148   : > { %1588 = vpow2.f32 %v1045_v15 }
 0x14d   : > { %v1413_v59 = vpop.f32.mrb[0].mxu1 }
 0x14e   : > { %v1005_v26 = vadd.f32 %v1413_v59, %v2448_v6  ;;  %v996_v1 = vpop.f32.mrb[1].mxu1 }
 0x14f   : > { %v1583_v53 = vpop.eup %1582  ;;  %v997_v37 = vadd.f32 %v2448_v6, %v996_v1  ;;  %v1414_v43 = vpop.f32.mrb[2].mxu1 }
 0x150   : > { %v1585_v44 = vpop.eup %1584  ;;  %v1077_v25 = vadd.f32 1.0, %v1583_v53  ;;  %v1037_v29 = vsub.f32 0.0, %v1005_v26  ;;  %v1008_v41 = vadd.f32 %v1414_v43, %v2448_v6  ;;  %v999_v9 = vpop.f32.mrb[3].mxu1 }
 0x151   : > { %v1587_v46 = vpop.eup %1586  ;;  %v1075_v54 = vadd.f32 1.0, %v1585_v44  ;;  %v1035_v45 = vsub.f32 0.0, %v997_v37  ;;  %v1000_v3 = vadd.f32 %v2448_v6, %v999_v9 }
 0x152   : > { %v1589_v38 = vpop.eup %1588  ;;  %1590 = vrcp.f32 %v1077_v25  ;;  %v1063_v49 = vmul.f32 1.442695, %v1037_v29  ;;  %v1078_v58 = vadd.f32 1.0, %v1587_v46  ;;  %v1038_v62 = vsub.f32 0.0, %v1008_v41 }
 0x153   : > { %1592 = vrcp.f32 %v1075_v54  ;;  %v1059_v24 = vmul.f32 1.442695, %v1035_v45  ;;  %v1036_v4 = vsub.f32 0.0, %v1000_v3  ;;  %v1076_v36 = vadd.f32 1.0, %v1589_v38 }
 0x154   : > { %1594 = vpow2.f32 %v1063_v49  ;;  %v1065_v21 = vmul.f32 1.442695, %v1038_v62 }
 0x155   : > { %1596 = vpow2.f32 %v1059_v24  ;;  %v1061_v2 = vmul.f32 1.442695, %v1036_v4 }
 0x156   : > { %1598 = vrcp.f32 %v1078_v58 }
 0x157   : > { %1600 = vpow2.f32 %v1065_v21 }
 0x158   : > { %1602 = vrcp.f32 %v1076_v36 }
 0x159   : > { %1604 = vpow2.f32 %v1061_v2 }
 0x15c   : > { %v1591_v13 = vpop.eup %1590 }
 0x15d   : > { %v1593_v55 = vpop.eup %1592  ;;  %v1109_v23 = vmul.f32 %v1591_v13, %v973_v51 }
 0x15e   : > { %v1595_v17 = vpop.eup %1594  ;;  %v1107_v27 = vmul.f32 %v1593_v55, %v965_v8 }
 0x15f   : > { %v1597_v5 = vpop.eup %1596  ;;  %1125 = vst [vmem:[%s2464_s29 + $0x10] sm:$0xff] %v1109_v23  ;;  %v1085_v34 = vadd.f32 1.0, %v1595_v17 }
 0x160   : > { %v1599_v39 = vpop.eup %1598  ;;  %1123 = vst [vmem:[%s2464_s29] sm:$0xff] %v1107_v27  ;;  %v1083_v32 = vadd.f32 1.0, %v1597_v5 }
 0x161   : > { %v1601_v12 = vpop.eup %1600  ;;  %1606 = vrcp.f32 %v1085_v34  ;;  %v1110_v31 = vmul.f32 %v1599_v39, %v976_v57 }
 0x162   : > { %v1603_v63 = vpop.eup %1602  ;;  %1608 = vrcp.f32 %v1083_v32  ;;  %v1086_v19 = vadd.f32 1.0, %v1601_v12 }
 0x163   : > { %v1605_v47 = vpop.eup %1604  ;;  %1126 = vst [vmem:[%s2464_s29 + $0x18] sm:$0xff] %v1110_v31  ;;  %v1108_v48 = vmul.f32 %v1603_v63, %v2454_v20 }
 0x164   : > { %1610 = vrcp.f32 %v1086_v19  ;;  %v1084_v0 = vadd.f32 1.0, %v1605_v47 }
 0x165   : > { %1124 = vst [vmem:[%s2464_s29 + $0x8] sm:$0xff] %v1108_v48 }
 0x166   : > { %1612 = vrcp.f32 %v1084_v0 }
 0x16b   : > { %v1607_v60 = vpop.eup %1606 }
 0x16c   : > { %v1609_v7 = vpop.eup %1608  ;;  %v1117_v56 = vmul.f32 %v1607_v60, %v1005_v26 }
 0x16d   : > { %v1115_v61 = vmul.f32 %v1609_v7, %v997_v37 }
 0x16e   : > { %v1611_v33 = vpop.eup %1610  ;;  %1133 = vst [vmem:[%s2464_s29 + $0x50] sm:$0xff] %v1117_v56 }
 0x16f   : > { %1131 = vst [vmem:[%s2464_s29 + $0x40] sm:$0xff] %v1115_v61  ;;  %v1118_v22 = vmul.f32 %v1611_v33, %v1008_v41 }
 0x170   : > { %v1613_v14 = vpop.eup %1612 }
 0x171   : > { %1134 = vst [vmem:[%s2464_s29 + $0x58] sm:$0xff] %v1118_v22  ;;  %v1116_v10 = vmul.f32 %v1613_v14, %v1000_v3  ;;  %v1409_v51 = vpop.f32.mrb[4].mxu0 }
 0x172   : > { %v989_v40 = vadd.f32 %v1409_v51, %v2448_v6  ;;  %v980_v8 = vpop.f32.mrb[5].mxu0 }
 0x173   : > { %1132 = vst [vmem:[%s2464_s29 + $0x48] sm:$0xff] %v1116_v10  ;;  %v981_v16 = vadd.f32 %v2448_v6, %v980_v8  ;;  %v1410_v11 = vpop.f32.mrb[6].mxu0 }
 0x174   : > { %v1033_v57 = vsub.f32 0.0, %v989_v40  ;;  %v992_v42 = vadd.f32 %v1410_v11, %v2448_v6  ;;  %v983_v28 = vpop.f32.mrb[7].mxu0 }
 0x175   : > { %v1031_v20 = vsub.f32 0.0, %v981_v16  ;;  %v984_v35 = vadd.f32 %v2448_v6, %v983_v28 }
 0x176   : > { %v1055_v52 = vmul.f32 1.442695, %v1033_v57  ;;  %v1034_v30 = vsub.f32 0.0, %v992_v42 }
 0x177   : > { %v1051_v18 = vmul.f32 1.442695, %v1031_v20  ;;  %v1032_v50 = vsub.f32 0.0, %v984_v35 }
 0x178   : > { %1614 = vpow2.f32 %v1055_v52  ;;  %v1057_v15 = vmul.f32 1.442695, %v1034_v30 }
 0x179   : > { %1616 = vpow2.f32 %v1051_v18  ;;  %v1053_v59 = vmul.f32 1.442695, %v1032_v50 }
 0x17a   : > { %1618 = vpow2.f32 %v1057_v15 }
 0x17b   : > { %1620 = vpow2.f32 %v1053_v59 }
 0x17f   : > { %v1417_v26 = vpop.f32.mrb[4].mxu1 }
 0x180   : > { %v1021_v1 = vadd.f32 %v1417_v26, %v2448_v6  ;;  %v1012_v53 = vpop.f32.mrb[5].mxu1 }
 0x181   : > { %v1013_v37 = vadd.f32 %v2448_v6, %v1012_v53  ;;  %v1418_v43 = vpop.f32.mrb[6].mxu1 }
 0x182   : > { %v1615_v44 = vpop.eup %1614  ;;  %v1041_v25 = vsub.f32 0.0, %v1021_v1  ;;  %v1024_v29 = vadd.f32 %v1418_v43, %v2448_v6  ;;  %v1015_v41 = vpop.f32.mrb[7].mxu1 }
 0x183   : > { %v1617_v9 = vpop.eup %1616  ;;  %v1081_v46 = vadd.f32 1.0, %v1615_v44  ;;  %v1039_v54 = vsub.f32 0.0, %v1013_v37  ;;  %v1016_v45 = vadd.f32 %v2448_v6, %v1015_v41 }
 0x184   : > { %v1619_v3 = vpop.eup %1618  ;;  %v1071_v38 = vmul.f32 1.442695, %v1041_v25  ;;  %v1079_v49 = vadd.f32 1.0, %v1617_v9  ;;  %v1042_v58 = vsub.f32 0.0, %v1024_v29 }
 0x185   : > { %v1621_v62 = vpop.eup %1620  ;;  %1622 = vrcp.f32 %v1081_v46  ;;  %v1067_v24 = vmul.f32 1.442695, %v1039_v54  ;;  %v1082_v4 = vadd.f32 1.0, %v1619_v3  ;;  %v1040_v21 = vsub.f32 0.0, %v1016_v45 }
 0x186   : > { %1624 = vpow2.f32 %v1071_v38  ;;  %v1073_v36 = vmul.f32 1.442695, %v1042_v58  ;;  %v1080_v2 = vadd.f32 1.0, %v1621_v62 }
 0x187   : > { %1626 = vrcp.f32 %v1079_v49  ;;  %v1069_v13 = vmul.f32 1.442695, %v1040_v21 }
 0x188   : > { %1628 = vpow2.f32 %v1067_v24 }
 0x189   : > { %1630 = vrcp.f32 %v1082_v4 }
 0x18a   : > { %1632 = vpow2.f32 %v1073_v36 }
 0x18b   : > { %1634 = vrcp.f32 %v1080_v2 }
 0x18c   : > { %1636 = vpow2.f32 %v1069_v13 }
 0x18f   : > { %v1623_v6 = vpop.eup %1622 }
 0x190   : > { %v1625_v55 = vpop.eup %1624  ;;  %v1113_v23 = vmul.f32 %v1623_v6, %v989_v40 }
 0x191   : > { %v1627_v17 = vpop.eup %1626  ;;  %v1089_v27 = vadd.f32 1.0, %v1625_v55 }
 0x192   : > { %v1629_v5 = vpop.eup %1628  ;;  %1129 = vst [vmem:[%s2464_s29 + $0x30] sm:$0xff] %v1113_v23  ;;  %v1111_v34 = vmul.f32 %v1627_v17, %v981_v16 }
 0x193   : > { %v1631_v39 = vpop.eup %1630  ;;  %1638 = vrcp.f32 %v1089_v27  ;;  %v1087_v32 = vadd.f32 1.0, %v1629_v5 }
 0x194   : > { %v1633_v12 = vpop.eup %1632  ;;  %1127 = vst [vmem:[%s2464_s29 + $0x20] sm:$0xff] %v1111_v34  ;;  %v1114_v31 = vmul.f32 %v1631_v39, %v992_v42 }
 0x195   : > { %v1635_v63 = vpop.eup %1634  ;;  %1640 = vrcp.f32 %v1087_v32  ;;  %v1090_v19 = vadd.f32 1.0, %v1633_v12 }
 0x196   : > { %v1637_v47 = vpop.eup %1636  ;;  %1130 = vst [vmem:[%s2464_s29 + $0x38] sm:$0xff] %v1114_v31  ;;  %v1112_v48 = vmul.f32 %v1635_v63, %v984_v35 }
 0x197   : > { %1642 = vrcp.f32 %v1090_v19  ;;  %v1088_v0 = vadd.f32 1.0, %v1637_v47 }
 0x198   : > { %1128 = vst [vmem:[%s2464_s29 + $0x28] sm:$0xff] %v1112_v48 }
 0x199   : > { %1644 = vrcp.f32 %v1088_v0 }
 0x19d   : > { %v1639_v60 = vpop.eup %1638 }
 0x19e   : > { %v1121_v7 = vmul.f32 %v1639_v60, %v1021_v1 }
 0x19f   : > { %v1641_v56 = vpop.eup %1640 }
 0x1a0   : > { %1137 = vst [vmem:[%s2464_s29 + $0x70] sm:$0xff] %v1121_v7  ;;  %v1119_v61 = vmul.f32 %v1641_v56, %v1013_v37 }
 0x1a1   : > { %v1643_v33 = vpop.eup %1642 }
 0x1a2   : > { %1135 = vst [vmem:[%s2464_s29 + $0x60] sm:$0xff] %v1119_v61  ;;  %v1122_v22 = vmul.f32 %v1643_v33, %v1024_v29 }
 0x1a3   : > { %v1645_v14 = vpop.eup %1644 }
 0x1a4   : > { %1138 = vst [vmem:[%s2464_s29 + $0x78] sm:$0xff] %v1122_v22  ;;  %v1120_v10 = vmul.f32 %v1645_v14, %v1016_v45 }
 0x1a6   : > { %1136 = vst [vmem:[%s2464_s29 + $0x68] sm:$0xff] %v1120_v10 }
 0x1a7   : > { %1659 = shalt.err (!%p1656_p7)
}
 0x1a8   : > { %s1660_s8 = scalar_lea.hbm %s2495_s21, 2048  ;;  %s1664_s12 = scalar_lea.hbm %s2560_s5, 8192 }
 0x1a9   : > { %p1661_p9 = scmp.ne.s32.totalorder %s2495_s21, %s1660_s8  ;;  %p1665_p12 = scmp.lt.u32.totalorder %s2495_s21, %s2560_s5 }
 0x1aa   : > { %p1666_p13 = scmp.lt.u32.totalorder %s1664_s12, %s1660_s8  ;;  %p1668_p1 = scmp.lt.u32.totalorder %s1660_s8, %s2495_s21 }
 0x1ab   : > { %p1662_p10 = pnand %p1661_p9, %p1826_p3 }
 0x1ac   : > { %p1667_p0 = por %p1666_p13, %p1665_p12 }
 0x1ad   : > { %p1663_p11 = pneg %p1662_p10 }
 0x1ae   : > { %p1669_p2 = por %p1668_p1, %p1667_p0 }
 0x1b0   : > { %p1670_p4 = pnand %p1669_p2, %p1663_p11 }
 0x1b2   : > { %1673 = shalt.err (!%p1670_p4)
}
 0x1b3   : > { %s1743_s26 = smov 128   ;;  %s1744_s16 = smov 8  }
 0x1b4   : > { %1437 = dma.vmem_to_hbm [thread:$0]  (%p1826_p3), %s2497_s15, 2048, %s2495_s21, %s2503_s22, %s1743_s26, %s1743_s26, %s1744_s16  }
 0x1b5 PF: > { %p1443_p5 = scmp.ge.s32.totalorder %s1740_s25, 2  ;;  %s1171_s17 = sand.u32 1, %s1712_s18  }
 0x1b6   : > { %s1172_s27 = scalar_lea.sflag [#allocation3], %s1171_s17 }
 0x1b7   : > { %p1440_p6 = pnand %p1443_p5, %p1835_p8 }
 0x1b9   : > { %1707 = dma.done.wait (!%p1440_p6), %s1172_s27, 2048  }
 0x1ba   : > { %1709 = vsyncadd (!%p1440_p6), %s1172_s27, 4294965248  ;;  %s18_s25 = sadd.s32 1, %s1740_s25   ;;  %s2599_s6 = sld [smem:[#allocation5_spill]] }
 0x1bb   : > { %p15_p7 = scmp.ge.s32.totalorder %s18_s25, 6   ;;  %s2600_s18 = smov %s1716_s19 }
 0x1bc   : > { %s2601_s19 = smov %s1720_s20  ;;  %s2602_s20 = smov %s1844_s11 }
 0x1bd   : > { %s2603_s21 = smov %s1732_s23  ;;  %s2604_s22 = smov %s1736_s24 }
 0x1be   : > { %s2605_s23 = smov %s2608_s28  ;;  %17 = sbr.rel (!%p15_p7) target bundleno = 5 (0x5), region = 77 }
 0x1c0   : > { %s2606_s24 = smov %s2599_s6 }
 0x1c5   :  { %1177 = vsyncpa [#allocation3], 1 }
 0x1c6   :  { %1179 = vsyncpa [#allocation3 + $0x1], 1 }

</bundles_post_ra>
